<compile_context>
chip_gen: v5e
topology: v5e:2x2
jax: 0.10.0
libtpu: 0.0.40
codegen_flags: <defaults>
</compile_context>

<pallas_src>
import jax
import jax.numpy as jnp
from jax.experimental import pallas as pl
from jax.experimental.pallas import tpu as pltpu


def _mscam_kernel(x_ref,
                  w1l_ref, b1l_ref, w2l_ref, b2l_ref,
                  w1g_ref, b1g_ref, w2g_ref, b2g_ref,
                  o_ref):
    # x_ref: (1, H*W, C) block for one batch element (lane-dense, C % 128 == 0).
    x = x_ref[0].astype(jnp.float32)                    # (HW, C)
    x_bf = x.astype(jnp.bfloat16)

    # ---- local attention branch: conv1x1 -> bn(+relu) -> conv1x1 -> bn(identity) ----
    hl = jnp.dot(x_bf, w1l_ref[...], preferred_element_type=jnp.float32)   # (HW, R)
    hl = jnp.maximum(hl + b1l_ref[...], 0.0)
    xl = jnp.dot(hl.astype(jnp.bfloat16), w2l_ref[...],
                 preferred_element_type=jnp.float32) + b2l_ref[...]         # (HW, C)

    # ---- global attention branch: GAP -> conv1x1 -> bn(+relu) -> conv1x1 -> bn ----
    gap = jnp.mean(x, axis=0, keepdims=True)                                # (1, C) f32
    hg = jnp.dot(gap.astype(jnp.bfloat16), w1g_ref[...],
                 preferred_element_type=jnp.float32)                        # (1, R)
    hg = jnp.maximum(hg + b1g_ref[...], 0.0)
    xg = jnp.dot(hg.astype(jnp.bfloat16), w2g_ref[...],
                 preferred_element_type=jnp.float32) + b2g_ref[...]         # (1, C)

    # ---- fuse: x * sigmoid(xl + xg) ----
    z = xl + xg                                                             # broadcast
    attn = 1.0 / (1.0 + jnp.exp(-z))
    o_ref[0] = (x * attn).astype(o_ref.dtype)


def mscam_pallas(x_nchw, params):
    """x_nchw: (N, C, H, W) float32.  params from prepare_params().  Returns NCHW."""
    N, C, H, W = x_nchw.shape
    HW = H * W
    w1l, b1l, w2l, b2l, w1g, b1g, w2g, b2g = params

    # NCHW -> (N, H*W, C): matmul-friendly, lane-dense last dim (wrapper-side plumbing).
    x = jnp.transpose(x_nchw, (0, 2, 3, 1)).reshape(N, HW, C)

    full = lambda a: pl.BlockSpec(a.shape, lambda n: (0,) * a.ndim)

    out = pl.pallas_call(
        _mscam_kernel,
        out_shape=jax.ShapeDtypeStruct((N, HW, C), x_nchw.dtype),
        grid_spec=pltpu.PrefetchScalarGridSpec(
            num_scalar_prefetch=0,
            grid=(N,),
            in_specs=[
                pl.BlockSpec((1, HW, C), lambda n: (n, 0, 0)),
                full(w1l), full(b1l), full(w2l), full(b2l),
                full(w1g), full(b1g), full(w2g), full(b2g),
            ],
            out_specs=pl.BlockSpec((1, HW, C), lambda n: (n, 0, 0)),
        ),
        compiler_params=pltpu.CompilerParams(
            dimension_semantics=("parallel",)),
    )(x, w1l, b1l, w2l, b2l, w1g, b1g, w2g, b2g)

    return jnp.transpose(out.reshape(N, H, W, C), (0, 3, 1, 2))


def _fold_bn(gamma, beta, mean, var, eps=1e-5):
    scale = gamma / jnp.sqrt(var + eps)
    shift = beta - mean * scale
    return scale, shift


def prepare_params(w1l_oi, bn1l, w2l_oi, bn2l, w1g_oi, bn1g, w2g_oi, bn2g):
    """PyTorch conv1x1 weights are (out, in); BN params are (gamma, beta, mean, var).

    Folds the BN scale into the conv weights (perf review), transposes to (in, out)
    matmul layout and casts weights to bf16.  Biases stay f32, shaped (1, C) for
    row broadcast inside the kernel.
    """
    def fold(w_oi, bn):
        scale, shift = _fold_bn(*bn)
        w = w_oi.T * scale[None, :]                     # (in, out), scale per out-chan
        return w.astype(jnp.bfloat16), shift[None, :].astype(jnp.float32)

    w1l, b1l = fold(w1l_oi, bn1l)
    w2l, b2l = fold(w2l_oi, bn2l)
    w1g, b1g = fold(w1g_oi, bn1g)
    w2g, b2g = fold(w2g_oi, bn2g)
    return (w1l, b1l, w2l, b2l, w1g, b1g, w2g, b2g)


def _reference(x_nchw, params):
    """Pure-JAX reference using the same folded params and bf16 matmul precision."""
    w1l, b1l, w2l, b2l, w1g, b1g, w2g, b2g = params
    N, C, H, W = x_nchw.shape
    x = jnp.transpose(x_nchw, (0, 2, 3, 1)).reshape(N, H * W, C)

    def branch(inp, w1, b1, w2, b2):
        h = jnp.dot(inp.astype(jnp.bfloat16), w1, preferred_element_type=jnp.float32)
        h = jnp.maximum(h + b1, 0.0)
        return jnp.dot(h.astype(jnp.bfloat16), w2,
                       preferred_element_type=jnp.float32) + b2

    xl = branch(x, w1l, b1l, w2l, b2l)                  # (N, HW, C)
    gap = jnp.mean(x, axis=1)                           # (N, C)
    xg = branch(gap, w1g, b1g, w2g, b2g)                # (N, C)
    z = xl + xg[:, None, :]
    out = x * (1.0 / (1.0 + jnp.exp(-z)))
    return jnp.transpose(out.reshape(N, H, W, C), (0, 3, 1, 2))


if __name__ == "__main__":
    # Small but TPU-friendly shapes: in_ch=128 (lane-dense), reduced_ch=32, 16x16, N=2.
    N, C, R, H, W = 2, 128, 32, 16, 16

    key = jax.random.PRNGKey(0)
    ks = jax.random.split(key, 9)

    # PyTorch conv1x1 weight layout (out, in); bias=False in conv1x1.
    w1l_oi = jax.random.normal(ks[0], (R, C), jnp.float32) * 0.1
    w2l_oi = jax.random.normal(ks[1], (C, R), jnp.float32) * 0.1
    w1g_oi = jax.random.normal(ks[2], (R, C), jnp.float32) * 0.1
    w2g_oi = jax.random.normal(ks[3], (C, R), jnp.float32) * 0.1

    def make_bn(k, c):
        kg, kb, km, kv = jax.random.split(k, 4)
        gamma = 1.0 + 0.1 * jax.random.normal(kg, (c,), jnp.float32)
        beta = 0.1 * jax.random.normal(kb, (c,), jnp.float32)
        mean = 0.1 * jax.random.normal(km, (c,), jnp.float32)
        var = jax.random.uniform(kv, (c,), jnp.float32, 0.5, 1.5)
        return gamma, beta, mean, var

    bn1l = make_bn(ks[4], R)
    bn2l = make_bn(ks[5], C)
    bn1g = make_bn(ks[6], R)
    bn2g = make_bn(ks[7], C)

    params = prepare_params(w1l_oi, bn1l, w2l_oi, bn2l, w1g_oi, bn1g, w2g_oi, bn2g)

    x_nchw = jax.random.normal(ks[8], (N, C, H, W), jnp.float32)

    out = jax.block_until_ready(mscam_pallas(x_nchw, params))
    ref = jax.block_until_ready(_reference(x_nchw, params))

    assert out.shape == x_nchw.shape
    assert jnp.max(jnp.abs(out - ref)) < 2e-3, "mismatch vs reference"

    # TODO(synk): training-mode ABN running-stat updates are not implemented; BN is
    # folded for inference only (matches module eval semantics).
    print("KERNEL_OK")
</pallas_src>

<mosaic_0001>
module attributes {stable_mosaic.version = 11 : i64} {
  func.func @_mscam_kernel(%arg0: i32, %arg1: memref<1x256x128xf32, #tpu.memory_space<vmem>>, %arg2: memref<128x32xbf16, #tpu.memory_space<vmem>>, %arg3: memref<1x32xf32, #tpu.memory_space<vmem>>, %arg4: memref<32x128xbf16, #tpu.memory_space<vmem>>, %arg5: memref<1x128xf32, #tpu.memory_space<vmem>>, %arg6: memref<128x32xbf16, #tpu.memory_space<vmem>>, %arg7: memref<1x32xf32, #tpu.memory_space<vmem>>, %arg8: memref<32x128xbf16, #tpu.memory_space<vmem>>, %arg9: memref<1x128xf32, #tpu.memory_space<vmem>>, %arg10: memref<1x256x128xf32, #tpu.memory_space<vmem>>) attributes {dimension_semantics = [#tpu.dimension_semantics<parallel>], iteration_bounds = array<i64: 2>, scalar_prefetch = 0 : i64, scratch_operands = 0 : i64, tpu.core_type = #tpu.core_type<tc>, window_params = [{transform_indices = @transform_0, window_bounds = array<i64: 1, 256, 128>}, {pipeline_mode = #tpu.pipeline_mode<synchronous>, transform_indices = @transform_1, window_bounds = array<i64: 128, 32>}, {pipeline_mode = #tpu.pipeline_mode<synchronous>, transform_indices = @transform_2, window_bounds = array<i64: 1, 32>}, {pipeline_mode = #tpu.pipeline_mode<synchronous>, transform_indices = @transform_3, window_bounds = array<i64: 32, 128>}, {pipeline_mode = #tpu.pipeline_mode<synchronous>, transform_indices = @transform_4, window_bounds = array<i64: 1, 128>}, {pipeline_mode = #tpu.pipeline_mode<synchronous>, transform_indices = @transform_5, window_bounds = array<i64: 128, 32>}, {pipeline_mode = #tpu.pipeline_mode<synchronous>, transform_indices = @transform_6, window_bounds = array<i64: 1, 32>}, {pipeline_mode = #tpu.pipeline_mode<synchronous>, transform_indices = @transform_7, window_bounds = array<i64: 32, 128>}, {pipeline_mode = #tpu.pipeline_mode<synchronous>, transform_indices = @transform_8, window_bounds = array<i64: 1, 128>}, {transform_indices = @transform_9, window_bounds = array<i64: 1, 256, 128>}]} {
    %c0 = arith.constant 0 : index
    %c0_0 = arith.constant 0 : index
    %c0_1 = arith.constant 0 : index
    %0 = vector.load %arg1[%c0, %c0_0, %c0_1] : memref<1x256x128xf32, #tpu.memory_space<vmem>>, vector<1x256x128xf32>
    %1 = vector.shape_cast %0 : vector<1x256x128xf32> to vector<256x128xf32>
    %2 = arith.truncf %1 : vector<256x128xf32> to vector<256x128xbf16>
    %c0_2 = arith.constant 0 : index
    %c0_3 = arith.constant 0 : index
    %3 = vector.load %arg2[%c0_2, %c0_3] : memref<128x32xbf16, #tpu.memory_space<vmem>>, vector<128x32xbf16>
    %cst = arith.constant dense<0.000000e+00> : vector<256x32xf32>
    %4 = tpu.matmul %2, %3, %cst {dimension_numbers = #tpu.dot_dimension_numbers<[1], [0], [0], [1], [0, 0, 1, 1], [], []>} : vector<256x128xbf16>, vector<128x32xbf16>, vector<256x32xf32> -> vector<256x32xf32>
    %c0_4 = arith.constant 0 : index
    %c0_5 = arith.constant 0 : index
    %5 = vector.load %arg3[%c0_4, %c0_5] : memref<1x32xf32, #tpu.memory_space<vmem>>, vector<1x32xf32>
    %6 = vector.broadcast %5 : vector<1x32xf32> to vector<256x32xf32>
    %7 = arith.addf %4, %6 : vector<256x32xf32>
    %cst_6 = arith.constant 0.000000e+00 : f32
    %8 = vector.broadcast %cst_6 : f32 to vector<256x32xf32>
    %9 = arith.maximumf %7, %8 : vector<256x32xf32>
    %10 = arith.truncf %9 : vector<256x32xf32> to vector<256x32xbf16>
    %c0_7 = arith.constant 0 : index
    %c0_8 = arith.constant 0 : index
    %11 = vector.load %arg4[%c0_7, %c0_8] : memref<32x128xbf16, #tpu.memory_space<vmem>>, vector<32x128xbf16>
    %cst_9 = arith.constant dense<0.000000e+00> : vector<256x128xf32>
    %12 = tpu.matmul %10, %11, %cst_9 {dimension_numbers = #tpu.dot_dimension_numbers<[1], [0], [0], [1], [0, 0, 1, 1], [], []>} : vector<256x32xbf16>, vector<32x128xbf16>, vector<256x128xf32> -> vector<256x128xf32>
    %c0_10 = arith.constant 0 : index
    %c0_11 = arith.constant 0 : index
    %13 = vector.load %arg5[%c0_10, %c0_11] : memref<1x128xf32, #tpu.memory_space<vmem>>, vector<1x128xf32>
    %14 = vector.broadcast %13 : vector<1x128xf32> to vector<256x128xf32>
    %15 = arith.addf %12, %14 : vector<256x128xf32>
    %cst_12 = arith.constant dense<0.000000e+00> : vector<128xf32>
    %16 = vector.multi_reduction <add>, %1, %cst_12 [0] : vector<256x128xf32> to vector<128xf32>
    %17 = vector.shape_cast %16 : vector<128xf32> to vector<1x128xf32>
    %cst_13 = arith.constant 2.560000e+02 : f32
    %18 = vector.broadcast %cst_13 : f32 to vector<1x128xf32>
    %19 = arith.divf %17, %18 : vector<1x128xf32>
    %20 = arith.truncf %19 : vector<1x128xf32> to vector<1x128xbf16>
    %c0_14 = arith.constant 0 : index
    %c0_15 = arith.constant 0 : index
    %21 = vector.load %arg6[%c0_14, %c0_15] : memref<128x32xbf16, #tpu.memory_space<vmem>>, vector<128x32xbf16>
    %cst_16 = arith.constant dense<0.000000e+00> : vector<1x32xf32>
    %22 = tpu.matmul %20, %21, %cst_16 {dimension_numbers = #tpu.dot_dimension_numbers<[1], [0], [0], [1], [0, 0, 1, 1], [], []>} : vector<1x128xbf16>, vector<128x32xbf16>, vector<1x32xf32> -> vector<1x32xf32>
    %c0_17 = arith.constant 0 : index
    %c0_18 = arith.constant 0 : index
    %23 = vector.load %arg7[%c0_17, %c0_18] : memref<1x32xf32, #tpu.memory_space<vmem>>, vector<1x32xf32>
    %24 = arith.addf %22, %23 : vector<1x32xf32>
    %cst_19 = arith.constant 0.000000e+00 : f32
    %25 = vector.broadcast %cst_19 : f32 to vector<1x32xf32>
    %26 = arith.maximumf %24, %25 : vector<1x32xf32>
    %27 = arith.truncf %26 : vector<1x32xf32> to vector<1x32xbf16>
    %c0_20 = arith.constant 0 : index
    %c0_21 = arith.constant 0 : index
    %28 = vector.load %arg8[%c0_20, %c0_21] : memref<32x128xbf16, #tpu.memory_space<vmem>>, vector<32x128xbf16>
    %cst_22 = arith.constant dense<0.000000e+00> : vector<1x128xf32>
    %29 = tpu.matmul %27, %28, %cst_22 {dimension_numbers = #tpu.dot_dimension_numbers<[1], [0], [0], [1], [0, 0, 1, 1], [], []>} : vector<1x32xbf16>, vector<32x128xbf16>, vector<1x128xf32> -> vector<1x128xf32>
    %c0_23 = arith.constant 0 : index
    %c0_24 = arith.constant 0 : index
    %30 = vector.load %arg9[%c0_23, %c0_24] : memref<1x128xf32, #tpu.memory_space<vmem>>, vector<1x128xf32>
    %31 = arith.addf %29, %30 : vector<1x128xf32>
    %32 = vector.broadcast %31 : vector<1x128xf32> to vector<256x128xf32>
    %33 = arith.addf %15, %32 : vector<256x128xf32>
    %cst_25 = arith.constant 0.000000e+00 : f32
    %34 = vector.broadcast %cst_25 : f32 to vector<256x128xf32>
    %35 = arith.subf %34, %33 : vector<256x128xf32>
    %36 = math.exp %35 : vector<256x128xf32>
    %cst_26 = arith.constant 1.000000e+00 : f32
    %37 = vector.broadcast %cst_26 : f32 to vector<256x128xf32>
    %38 = arith.addf %37, %36 : vector<256x128xf32>
    %cst_27 = arith.constant 1.000000e+00 : f32
    %39 = vector.broadcast %cst_27 : f32 to vector<256x128xf32>
    %40 = arith.divf %39, %38 : vector<256x128xf32>
    %41 = arith.mulf %1, %40 : vector<256x128xf32>
    %c0_28 = arith.constant 0 : index
    %c0_29 = arith.constant 0 : index
    %c0_30 = arith.constant 0 : index
    %42 = vector.load %arg10[%c0_28, %c0_29, %c0_30] : memref<1x256x128xf32, #tpu.memory_space<vmem>>, vector<1x256x128xf32>
    %43 = vector.shape_cast %42 : vector<1x256x128xf32> to vector<256x128xf32>
    %44 = vector.shape_cast %41 : vector<256x128xf32> to vector<1x256x128xf32>
    tpu.vector_store %arg10[%c0_28, %c0_29, %c0_30], %44 {strides = array<i32>} : memref<1x256x128xf32, #tpu.memory_space<vmem>>, vector<1x256x128xf32>,
    return
  }
  func.func @transform_0(%arg0: i32) -> (i32, i32, i32) {
    %c0_i32 = arith.constant 0 : i32
    %c0_i32_0 = arith.constant 0 : i32
    %c0_i32_1 = arith.constant 0 : i32
    return %arg0, %c0_i32, %c0_i32_0 : i32, i32, i32
  }
  func.func @transform_1(%arg0: i32) -> (i32, i32) {
    %c0_i32 = arith.constant 0 : i32
    %c0_i32_0 = arith.constant 0 : i32
    %c0_i32_1 = arith.constant 0 : i32
    return %c0_i32, %c0_i32_0 : i32, i32
  }
  func.func @transform_2(%arg0: i32) -> (i32, i32) {
    %c0_i32 = arith.constant 0 : i32
    %c0_i32_0 = arith.constant 0 : i32
    %c0_i32_1 = arith.constant 0 : i32
    return %c0_i32, %c0_i32_0 : i32, i32
  }
  func.func @transform_3(%arg0: i32) -> (i32, i32) {
    %c0_i32 = arith.constant 0 : i32
    %c0_i32_0 = arith.constant 0 : i32
    %c0_i32_1 = arith.constant 0 : i32
    return %c0_i32, %c0_i32_0 : i32, i32
  }
  func.func @transform_4(%arg0: i32) -> (i32, i32) {
    %c0_i32 = arith.constant 0 : i32
    %c0_i32_0 = arith.constant 0 : i32
    %c0_i32_1 = arith.constant 0 : i32
    return %c0_i32, %c0_i32_0 : i32, i32
  }
  func.func @transform_5(%arg0: i32) -> (i32, i32) {
    %c0_i32 = arith.constant 0 : i32
    %c0_i32_0 = arith.constant 0 : i32
    %c0_i32_1 = arith.constant 0 : i32
    return %c0_i32, %c0_i32_0 : i32, i32
  }
  func.func @transform_6(%arg0: i32) -> (i32, i32) {
    %c0_i32 = arith.constant 0 : i32
    %c0_i32_0 = arith.constant 0 : i32
    %c0_i32_1 = arith.constant 0 : i32
    return %c0_i32, %c0_i32_0 : i32, i32
  }
  func.func @transform_7(%arg0: i32) -> (i32, i32) {
    %c0_i32 = arith.constant 0 : i32
    %c0_i32_0 = arith.constant 0 : i32
    %c0_i32_1 = arith.constant 0 : i32
    return %c0_i32, %c0_i32_0 : i32, i32
  }
  func.func @transform_8(%arg0: i32) -> (i32, i32) {
    %c0_i32 = arith.constant 0 : i32
    %c0_i32_0 = arith.constant 0 : i32
    %c0_i32_1 = arith.constant 0 : i32
    return %c0_i32, %c0_i32_0 : i32, i32
  }
  func.func @transform_9(%arg0: i32) -> (i32, i32, i32) {
    %c0_i32 = arith.constant 0 : i32
    %c0_i32_0 = arith.constant 0 : i32
    %c0_i32_1 = arith.constant 0 : i32
    return %arg0, %c0_i32, %c0_i32_0 : i32, i32, i32
  }
}

</mosaic_0001>

<bundles_post_ra>
// kernel: tpu_custom_call.1
= control target key start
LH: loop header
LB: loop body
LE: loop exit
PB: predicated region body
PF: predicated region fallthrough
CT: control target
= control target key end

     0   :  { %14 = vsyncpa [#allocation3], 0  ;;  %s3921_s0 = inlined_call_operand.hbm [shape: f32[2,256,128], index: 0, kind: input, shape index: {}]   ;;  %s3922_s1 = inlined_call_operand.vmem [shape: bf16[128,32], index: 1, kind: input, shape index: {}]   ;;  %s3923_s2 = inlined_call_operand.vmem [shape: f32[1,32], index: 2, kind: input, shape index: {}]   ;;  %s3924_s3 = inlined_call_operand.vmem [shape: bf16[32,128], index: 3, kind: input, shape index: {}]   ;;  %s3925_s4 = inlined_call_operand.vmem [shape: f32[1,128], index: 4, kind: input, shape index: {}]   ;;  %s3926_s5 = inlined_call_operand.vmem [shape: bf16[128,32], index: 5, kind: input, shape index: {}]   ;;  %s3927_s6 = inlined_call_operand.vmem [shape: f32[1,32], index: 6, kind: input, shape index: {}]   ;;  %s3928_s7 = inlined_call_operand.vmem [shape: bf16[32,128], index: 7, kind: input, shape index: {}]   ;;  %s3929_s8 = inlined_call_operand.vmem [shape: f32[1,128], index: 8, kind: input, shape index: {}]   ;;  %s3930_s9 = inlined_call_operand.hbm [shape: f32[2,256,128], index: 9, kind: output, shape index: {}]  }
   0x1   :  { %16 = vsyncpa [#allocation3 + $0x1], 0 }
   0x2   :  { %17 = vsyncpa [#allocation4], 0 }
   0x3   :  { %19 = vsyncpa [#allocation4 + $0x1], 0  ;;  %s2229_s30 = smov 0   ;;  %s2231_s10 = smov 0  }
   0x4   :  { %s2233_s11 = smov 0   ;;  %s2235_s12 = smov 0  }
   0x5 LB: > { %3944 = sst [smem:[#allocation8_spill]] %s2168_s11  ;;  %s2250_s13 = sadd.s32 4294967295, %s2172_s12   ;;  %s2172_s12 = sphi %s2235_s12, %s4114_s12   ;;  %s2168_s11 = sphi %s2233_s11, %s4116_s11   ;;  %s2164_s10 = sphi %s2231_s10, %s4118_s10   ;;  %s2160_s30 = sphi %s2229_s30, %s4117_s30  }
   0x6   : > { %s1718_s14 = sadd.s32 4294967294, %s2172_s12   ;;  %s2254_s15 = sadd.s32 1, %s2172_s12  }
   0x7   : > { %3945 = sst [smem:[#allocation9_spill]] %s2254_s15  ;;  %s32_s16 = sadd.s32 1, %s2168_s11 }
   0x8   : > { %s29_s17 = ssub.s32 %s2172_s12, %s2254_s15  ;;  %p39_p0 = scmp.ne.s32.totalorder %s2168_s11, %s2164_s10 }
   0x9   : > { %p30_p1 = scmp.eq.s32.totalorder %s29_s17, 0  ;;  %p40_p2 = scmp.eq.s32.totalorder %s2172_s12, 0 }
   0xa   : > { %p45_p3 = scmp.ne.s32.totalorder %s2164_s10, %s2160_s30  ;;  %p46_p4 = scmp.eq.s32.totalorder %s2250_s13, 0 }
   0xb   : > { %s2266_s18 = scalar_select %p30_p1, %s2168_s11, %s32_s16  }
   0xc   : > { %p2268_p5 = por %p40_p2, %p39_p0  ;;  %p2272_p6 = por %p46_p4, %p45_p3 }
   0xd   : > { %3946 = sst [smem:[#allocation10_spill]] %s2266_s18  ;;  %p237_p7 = scmp.eq.s32.totalorder %s2250_s13, 1 }
   0xe   : > { %p243_p8 = scmp.eq.s32.totalorder %s1718_s14, 1  ;;  %p1873_p10 = scmp.lt.s32.totalorder %s2172_s12, 2 }
   0xf   : > { %p2279_p11 = por %p237_p7, %p39_p0  ;;  %s287_s23 = sand.u32 1, %s2168_s11  }
  0x10   : > { %p2283_p12 = por %p243_p8, %p45_p3  ;;  %s1829_s24 = sshll.u32 %s2172_s12, 8 }
  0x11   : > { %s1721_s25 = sshll.u32 %s287_s23, 8  ;;  %s296_s28 = scalar_lea.hbm %s3921_s0, %s1829_s24 }
  0x12   : > { %s297_s29 = sshll.u32 %s296_s28, 4  ;;  %s291_s14 = scalar_lea.vmem [#allocation2], %s1721_s25  ;;  %s298_s29 = int_to_ptr.hbm [resolvable:$true] %s297_s29 }
  0x13   : > { %s299_s16 = sshll.u32 %s291_s14, 4  ;;  %p2294_p13 = pnand %p1873_p10, %p2268_p5  ;;  %s300_s16 = int_to_ptr.vmem [resolvable:$true] %s299_s16 }
  0x14   : > { %p1724_p0 = scmp.ge.s32.totalorder %s2172_s12, 1  ;;  %p307_p1 = scmp.lt.s32.totalorder %s2172_s12, 3 }
  0x15   : > { %s288_s18 = scalar_lea.sflag [#allocation3], %s287_s23  ;;  %s2076_s11 = sshra.s32 %s298_s29, 4  ;;  %s2077_s11 = int_to_ptr.hbm [resolvable:$true] %s2076_s11 }
  0x16   : > { %s2078_s15 = scalar_lea.hbm %s2077_s11, 256  ;;  %p2080_p3 = pneg %p2294_p13 }
  0x17   : > { %p2079_p2 = scmp.ne.s32.totalorder %s2077_s11, %s2078_s15  ;;  %s2083_s19 = scalar_lea.hbm %s3921_s0, 512 }
  0x18   : > { %p2084_p5 = scmp.lt.s32.totalorder %s2077_s11, %s3921_s0  ;;  %p2085_p8 = scmp.lt.s32.totalorder %s2083_s19, %s2078_s15 }
  0x19   : > { %p2081_p4 = pnand %p2080_p3, %p2079_p2 }
  0x1a   : > { %p2086_p10 = por %p2085_p8, %p2084_p5 }
  0x1b   : > { %p2082_p7 = pneg %p2081_p4 }
  0x1d   : > { %p2087_p9 = pnand %p2086_p10, %p2082_p7 }
  0x1f   : > { %2090 = shalt.err (!%p2087_p9)
}
  0x20   : > { %s2174_s23 = smov 128   ;;  %s2175_s28 = smov 8  }
  0x21   : > { %1868 = dma.hbm_to_vmem [thread:$0]  (!%p2294_p13), %s298_s29, 4096, %s300_s16, %s288_s18, %s2174_s23, %s2174_s23, %s2175_s28  }
  0x22   : > { %p308_p2 = pnand %p1724_p0, %p307_p1 }
  0x24   : > { %311 = sbr.rel (%p308_p2) target bundleno = 770 (0x302), region = 56 }
  0x29   : > { %s2315_s14 = sand.u32 1, %s2164_s10  }
  0x2a   : > { %s1725_s11 = sshll.u32 %s2315_s14, 8  ;;  %s314_s15 = scalar_lea.sflag [#allocation3], %s2315_s14 }
  0x2b   : > { %s2321_s24 = scalar_lea.vmem [#allocation2], %s1725_s11 }
  0x2c   : > { %2151 = dma.done.wait (%p2272_p6), %s314_s15, 4096  }
  0x2d   : > { %2153 = vsyncadd (%p2272_p6), %s314_s15, 4294963200  ;;  %v1837_v0 = vld [vmem:[%s3922_s1 + $0x38] sm:$0xff]  ;;  %v1836_v1 = vld [vmem:[%s3922_s1 + $0x30] sm:$0xff]  ;;  %vm627_vm0 = vcmask 261120   ;;  %s3605_s18 = scalar_lea.vmem [#allocation5], %s1725_s11  ;;  %s1850_s11 = sshll.u32 %s2250_s13, 8 }
  0x2e   : > { %470 = vmatpush.bf16.msra.mxu0 %v1837_v0  ;;  %1851 = vmatpush.bf16.msra.mxu3 %v1837_v0  ;;  %v1835_v2 = vld [vmem:[%s3922_s1 + $0x28] sm:$0xff]  ;;  %v1834_v3 = vld [vmem:[%s3922_s1 + $0x20] sm:$0xff]  ;;  %v1833_v4 = vld [vmem:[%s3922_s1 + $0x18] sm:$0xff]  ;;  %s1641_s16 = scalar_lea.hbm %s3930_s9, %s1850_s11  ;;  %s1642_s17 = sshll.u32 %s3605_s18, 4  ;;  %s1643_s17 = int_to_ptr.vmem [resolvable:$true] %s1642_s17 }
  0x2f   : > { %v1832_v5 = vld [vmem:[%s3922_s1 + $0x10] sm:$0xff]  ;;  %v1831_v6 = vld [vmem:[%s3922_s1 + $0x8] sm:$0xff]  ;;  %v1830_v7 = vld [vmem:[%s3922_s1] sm:$0xff]  ;;  %s1644_s25 = sshll.u32 %s1641_s16, 4  ;;  %s1630_s19 = scalar_lea.sflag [#allocation4], %s2315_s14  ;;  %s1645_s25 = int_to_ptr.hbm [resolvable:$true] %s1644_s25 }
  0x30   : > { %v2352_v8 = vld [vmem:[%s2321_s24] sm:$0xff]  ;;  %v355_v9 = vld [vmem:[%s2321_s24 + $0x8] sm:$0xff]  ;;  %v2356_v10 = vld [vmem:[%s2321_s24 + $0x90] sm:$0xff]  ;;  %s2120_s20 = sshra.s32 %s1645_s25, 4  ;;  %s2121_s20 = int_to_ptr.hbm [resolvable:$true] %s2120_s20 }
  0x31   : > { %v2359_v11 = vld [vmem:[%s2321_s24 + $0x98] sm:$0xff]  ;;  %v386_v12 = vpack.c.bf16 %v355_v9, %v2352_v8  ;;  %v356_v14 = vld [vmem:[%s2321_s24 + $0x10] sm:$0xff]  ;;  %v2367_v16 = vld [vmem:[%s2321_s24 + $0xa0] sm:$0xff]  ;;  %v765_v51 = vadd.f32 %v355_v9, %v2352_v8  ;;  %s2122_s26 = scalar_lea.hbm %s2121_s20, 256  ;;  %p2127_p0 = scmp.lt.s32.totalorder %s2121_s20, %s3930_s9 }
  0x32   : > { %471 = vmatpush.bf16.msra.mxu0 %v1836_v1  ;;  %1852 = vmatpush.bf16.msra.mxu3 %v1836_v1  ;;  %v395_v13 = vpack.c.bf16 %v2359_v11, %v2356_v10  ;;  %v357_v15 = vld [vmem:[%s2321_s24 + $0x18] sm:$0xff]  ;;  %v2370_v17 = vld [vmem:[%s2321_s24 + $0xa8] sm:$0xff]  ;;  %v358_v20 = vld [vmem:[%s2321_s24 + $0x20] sm:$0xff]  ;;  %p2123_p6 = scmp.ne.s32.totalorder %s2121_s20, %s2122_s26 }
  0x33   : > { %v387_v18 = vpack.c.bf16 %v357_v15, %v356_v14  ;;  %v396_v19 = vpack.c.bf16 %v2370_v17, %v2367_v16  ;;  %v359_v21 = vld [vmem:[%s2321_s24 + $0x28] sm:$0xff]  ;;  %v2377_v22 = vld [vmem:[%s2321_s24 + $0xb0] sm:$0xff]  ;;  %v2380_v23 = vld [vmem:[%s2321_s24 + $0xb8] sm:$0xff]  ;;  %v766_v55 = vadd.f32 %v765_v51, %v356_v14 }
  0x34   : > { %v388_v24 = vpack.c.bf16 %v359_v21, %v358_v20  ;;  %v397_v25 = vpack.c.bf16 %v2380_v23, %v2377_v22  ;;  %v360_v26 = vld [vmem:[%s2321_s24 + $0x30] sm:$0xff]  ;;  %v361_v27 = vld [vmem:[%s2321_s24 + $0x38] sm:$0xff]  ;;  %v2387_v28 = vld [vmem:[%s2321_s24 + $0xc0] sm:$0xff]  ;;  %p2124_p9 = pnand %p2123_p6, %p2279_p11 }
  0x35   : > { %v2390_v29 = vld [vmem:[%s2321_s24 + $0xc8] sm:$0xff]  ;;  %v389_v30 = vpack.c.bf16 %v361_v27, %v360_v26  ;;  %v362_v32 = vld [vmem:[%s2321_s24 + $0x40] sm:$0xff]  ;;  %v2397_v34 = vld [vmem:[%s2321_s24 + $0xd0] sm:$0xff]  ;;  %v767_v57 = vadd.f32 %v766_v55, %v357_v15 }
  0x36   : > { %472 = vmatpush.bf16.msra.mxu0 %v1835_v2  ;;  %1853 = vmatpush.bf16.msra.mxu3 %v1835_v2  ;;  %v398_v31 = vpack.c.bf16 %v2390_v29, %v2387_v28  ;;  %v363_v33 = vld [vmem:[%s2321_s24 + $0x48] sm:$0xff]  ;;  %v2400_v35 = vld [vmem:[%s2321_s24 + $0xd8] sm:$0xff]  ;;  %v364_v38 = vld [vmem:[%s2321_s24 + $0x50] sm:$0xff]  ;;  %p2125_p13 = pneg %p2124_p9 }
  0x37   : > { %v390_v36 = vpack.c.bf16 %v363_v33, %v362_v32  ;;  %v399_v37 = vpack.c.bf16 %v2400_v35, %v2397_v34  ;;  %v365_v39 = vld [vmem:[%s2321_s24 + $0x58] sm:$0xff]  ;;  %v2407_v40 = vld [vmem:[%s2321_s24 + $0xe0] sm:$0xff]  ;;  %v2410_v41 = vld [vmem:[%s2321_s24 + $0xe8] sm:$0xff]  ;;  %v768_v58 = vadd.f32 %v767_v57, %v358_v20 }
  0x38   : > { %v391_v42 = vpack.c.bf16 %v365_v39, %v364_v38  ;;  %v400_v43 = vpack.c.bf16 %v2410_v41, %v2407_v40  ;;  %v366_v44 = vld [vmem:[%s2321_s24 + $0x60] sm:$0xff]  ;;  %v367_v45 = vld [vmem:[%s2321_s24 + $0x68] sm:$0xff]  ;;  %v2417_v46 = vld [vmem:[%s2321_s24 + $0xf0] sm:$0xff] }
  0x39   : > { %v2420_v47 = vld [vmem:[%s2321_s24 + $0xf8] sm:$0xff]  ;;  %v392_v48 = vpack.c.bf16 %v367_v45, %v366_v44  ;;  %v1839_v50 = vld [vmem:[%s3924_s3 + $0x8] sm:$0xff]  ;;  %v1838_v52 = vld [vmem:[%s3924_s3] sm:$0xff]  ;;  %v769_v59 = vadd.f32 %v768_v58, %v359_v21 }
  0x3a   : > { %473 = vmatpush.bf16.msra.mxu0 %v1834_v3  ;;  %1854 = vmatpush.bf16.msra.mxu3 %v1834_v3  ;;  %v401_v49 = vpack.c.bf16 %v2420_v47, %v2417_v46  ;;  %v368_v53 = vld [vmem:[%s2321_s24 + $0x70] sm:$0xff]  ;;  %v369_v54 = vld [vmem:[%s2321_s24 + $0x78] sm:$0xff]  ;;  %v370_v60 = vld [vmem:[%s2321_s24 + $0x80] sm:$0xff] }
  0x3b   : > { %682 = vmatpush.bf16.msra.mxu1 %v1839_v50  ;;  %1859 = vmatpush.bf16.msra.mxu2 %v1839_v50  ;;  %v393_v56 = vpack.c.bf16 %v369_v54, %v368_v53  ;;  %v371_v61 = vld [vmem:[%s2321_s24 + $0x88] sm:$0xff]  ;;  %v770_v62 = vadd.f32 %v769_v59, %v360_v26  ;;  %v2438_v2 = vld [vmem:[%s3923_s2] ss:$0 sm:$0xff] }
  0x3c   : > { %v394_v63 = vpack.c.bf16 %v371_v61, %v370_v60  ;;  %v1845_v50 = vld [vmem:[%s3926_s5 + $0x28] sm:$0xff] }
  0x3d   : > { %v771_v1 = vadd.f32 %v770_v62, %v361_v27 }
  0x3e   : > { %474 = vmatpush.bf16.msra.mxu0 %v1833_v4  ;;  %1855 = vmatpush.bf16.msra.mxu3 %v1833_v4 }
  0x3f   : > { %683 = vmatpush.bf16.msra.mxu1 %v1838_v52  ;;  %1860 = vmatpush.bf16.msra.mxu2 %v1838_v52  ;;  %v772_v3 = vadd.f32 %v771_v1, %v362_v32 }
  0x41   : > { %v773_v8 = vadd.f32 %v772_v3, %v363_v33 }
  0x42   : > { %475 = vmatpush.bf16.msra.mxu0 %v1832_v5  ;;  %1856 = vmatpush.bf16.msra.mxu3 %v1832_v5  ;;  %v1847_v5 = vld [vmem:[%s3926_s5 + $0x38] sm:$0xff] }
  0x43   : > { %876 = vmatpush.bf16.msrb.mxu2 %v1847_v5  ;;  %v774_v14 = vadd.f32 %v773_v8, %v364_v38 }
  0x46   : > { %476 = vmatpush.bf16.msra.mxu0 %v1831_v6  ;;  %1857 = vmatpush.bf16.msra.mxu3 %v1831_v6 }
  0x4a   : > { %477 = vmatpush.bf16.msra.mxu0 %v1830_v7  ;;  %1858 = vmatpush.bf16.msra.mxu3 %v1830_v7 }
  0x4d   : > { %478 = vmatmul.bf16.vlgmr.msra.gmra.mxu0 %v386_v12  ;;  %523 = vmatmul.bf16.vlgmr.msra.gmra.mxu3 %v395_v13 }
  0x5d   : > { %483 = vmatmul.bf16.gmra.mxu0 %v387_v18  ;;  %528 = vmatmul.bf16.gmra.mxu3 %v396_v19 }
  0x6d   : > { %488 = vmatmul.bf16.gmra.mxu0 %v388_v24  ;;  %533 = vmatmul.bf16.gmra.mxu3 %v397_v25  ;;  %v775_v24 = vadd.f32 %v774_v14, %v365_v39 }
  0x7d   : > { %493 = vmatmul.bf16.gmra.mxu0 %v389_v30  ;;  %538 = vmatmul.bf16.gmra.mxu3 %v398_v31  ;;  %v1846_v30 = vld [vmem:[%s3926_s5 + $0x30] sm:$0xff]  ;;  %v776_v31 = vadd.f32 %v775_v24, %v366_v44 }
  0x7e   : > { %877 = vmatpush.bf16.msrb.mxu2 %v1846_v30 }
  0x82   : > { %878 = vmatpush.bf16.msrb.mxu2 %v1845_v50 }
  0x8d   : > { %498 = vmatmul.bf16.gmra.mxu0 %v390_v36  ;;  %543 = vmatmul.bf16.gmra.mxu3 %v399_v37  ;;  %v777_v37 = vadd.f32 %v776_v31, %v367_v45 }
  0x8f   : > { %v778_v39 = vadd.f32 %v777_v37, %v368_v53 }
  0x91   : > { %v779_v45 = vadd.f32 %v778_v39, %v369_v54 }
  0x93   : > { %v780_v58 = vadd.f32 %v779_v45, %v370_v60  ;;  %v1844_v60 = vld [vmem:[%s3926_s5 + $0x20] sm:$0xff] }
  0x94   : > { %879 = vmatpush.bf16.msrb.mxu2 %v1844_v60 }
  0x9d   : > { %503 = vmatmul.bf16.gmra.mxu0 %v391_v42  ;;  %548 = vmatmul.bf16.gmra.mxu3 %v400_v43 }
  0xad   : > { %508 = vmatmul.bf16.gmra.mxu0 %v392_v48  ;;  %553 = vmatmul.bf16.gmra.mxu3 %v401_v49 }
  0xbd   : > { %513 = vmatmul.bf16.gmra.mxu0 %v393_v56 }
  0xca   : > { %v479_v0 = vpop.f32.mrf.mxu0 }
  0xcb   : > { %v480_v4 = vadd.f32 %v2438_v2, %v479_v0 }
  0xcd   : > { %518 = vmatmul.bf16.gmra.mxu0 %v394_v63  ;;  %v559_v9 = vmax.f32 %v480_v4, 0.0  ;;  %v781_v63 = vadd.f32 %v780_v58, %v371_v61 }
  0xcf   : > { %v782_v4 = vadd.f32 %v781_v63, %v2356_v10 }
  0xd0   : > { %v524_v6 = vpop.f32.mrf.mxu3 }
  0xd1   : > { %v525_v15 = vadd.f32 %v2438_v2, %v524_v6  ;;  %v783_v8 = vadd.f32 %v782_v4, %v2359_v11 }
  0xd2   : > { %v481_v7 = vpop.f32.mrf.mxu0 }
  0xd3   : > { %v482_v12 = vadd.f32 %v2438_v2, %v481_v7  ;;  %v577_v25 = vmax.f32 %v525_v15, 0.0  ;;  %v784_v10 = vadd.f32 %v783_v8, %v2367_v16  ;;  %v1843_v15 = vld [vmem:[%s3926_s5 + $0x18] sm:$0xff] }
  0xd4   : > { %880 = vmatpush.bf16.msrb.mxu2 %v1843_v15 }
  0xd5   : > { %v560_v13 = vmax.f32 %v482_v12, 0.0 }
  0xd7   : > { %v591_v18 = vpack.c.bf16 %v560_v13, %v559_v9 }
  0xd8   : > { %v526_v19 = vpop.f32.mrf.mxu3 }
  0xd9   : > { %v527_v20 = vadd.f32 %v2438_v2, %v526_v19  ;;  %1767 = vmatmul.msk.bf16.vlgmr.msra.gmra.mxu1 %vm627_vm0, %v591_v18 }
  0xda   : > { %v484_v21 = vpop.f32.mrf.mxu0 }
  0xdb   : > { %v578_v26 = vmax.f32 %v527_v20, 0.0  ;;  %v485_v32 = vadd.f32 %v2438_v2, %v484_v21  ;;  %v785_v20 = vadd.f32 %v784_v10, %v2370_v17 }
  0xdd   : > { %v2448_v27 = vpack.c.bf16 %v578_v26, %v577_v25  ;;  %v561_v38 = vmax.f32 %v485_v32, 0.0  ;;  %v786_v25 = vadd.f32 %v785_v20, %v2377_v22 }
  0xe0   : > { %v529_v33 = vpop.f32.mrf.mxu3 }
  0xe1   : > { %v530_v48 = vadd.f32 %v2438_v2, %v529_v33  ;;  %v787_v33 = vadd.f32 %v786_v25, %v2380_v23 }
  0xe2   : > { %v486_v36 = vpop.f32.mrf.mxu0 }
  0xe3   : > { %v487_v42 = vadd.f32 %v2438_v2, %v486_v36  ;;  %v579_v55 = vmax.f32 %v530_v48, 0.0  ;;  %v788_v22 = vadd.f32 %v787_v33, %v2387_v28  ;;  %v1841_v28 = vld [vmem:[%s3926_s5 + $0x8] sm:$0xff] }
  0xe5   : > { %v562_v43 = vmax.f32 %v487_v42, 0.0  ;;  %v789_v48 = vadd.f32 %v788_v22, %v2390_v29 }
  0xe7   : > { %v592_v49 = vpack.c.bf16 %v562_v43, %v561_v38  ;;  %v1842_v38 = vld [vmem:[%s3926_s5 + $0x10] sm:$0xff] }
  0xe8   : > { %v531_v51 = vpop.f32.mrf.mxu3  ;;  %881 = vmatpush.bf16.msrb.mxu2 %v1842_v38 }
  0xe9   : > { %v532_v44 = vadd.f32 %v2438_v2, %v531_v51  ;;  %1768 = vmatmul.msk.bf16.gmra.mxu1 %vm627_vm0, %v592_v49 }
  0xea   : > { %v489_v52 = vpop.f32.mrf.mxu0 }
  0xeb   : > { %v580_v56 = vmax.f32 %v532_v44, 0.0  ;;  %v490_v53 = vadd.f32 %v2438_v2, %v489_v52  ;;  %v790_v52 = vadd.f32 %v789_v48, %v2397_v34 }
  0xec   : > { %882 = vmatpush.bf16.msrb.mxu2 %v1841_v28  ;;  %v1849_v28 = vld [vmem:[%s3928_s7 + $0x8] sm:$0xff] }
  0xed   : > { %v601_v57 = vpack.c.bf16 %v580_v56, %v579_v55  ;;  %v563_v0 = vmax.f32 %v490_v53, 0.0  ;;  %v791_v58 = vadd.f32 %v790_v52, %v2400_v35  ;;  %v1840_v35 = vld [vmem:[%s3926_s5] sm:$0xff]  ;;  %917 = vmatpush.bf16.msrb.mxu3 %v1849_v28 }
  0xef   : > { %1777 = vmatmul.msk.bf16.vlgmr.msra.gmra.mxu2 %vm627_vm0, %v601_v57 }
  0xf0   : > { %v534_v59 = vpop.f32.mrf.mxu3  ;;  %883 = vmatpush.bf16.msrb.mxu2 %v1840_v35 }
  0xf1   : > { %v535_v5 = vadd.f32 %v2438_v2, %v534_v59 }
  0xf2   : > { %v491_v62 = vpop.f32.mrf.mxu0 }
  0xf3   : > { %v492_v1 = vadd.f32 %v2438_v2, %v491_v62  ;;  %v581_v9 = vmax.f32 %v535_v5, 0.0  ;;  %v792_v62 = vadd.f32 %v791_v58, %v2407_v40 }
  0xf5   : > { %v564_v3 = vmax.f32 %v492_v1, 0.0 }
  0xf7   : > { %v593_v54 = vpack.c.bf16 %v564_v3, %v563_v0  ;;  %v793_v3 = vadd.f32 %v792_v62, %v2410_v41 }
  0xf8   : > { %v536_v6 = vpop.f32.mrf.mxu3 }
  0xf9   : > { %v537_v7 = vadd.f32 %v2438_v2, %v536_v6  ;;  %1769 = vmatmul.msk.bf16.gmra.mxu1 %vm627_vm0, %v593_v54  ;;  %v794_v60 = vadd.f32 %v793_v3, %v2417_v46 }
  0xfa   : > { %v494_v61 = vpop.f32.mrf.mxu0 }
  0xfb   : > { %v582_v12 = vmax.f32 %v537_v7, 0.0  ;;  %v495_v14 = vadd.f32 %v2438_v2, %v494_v61  ;;  %v795_v41 = vadd.f32 %v794_v60, %v2420_v47 }
  0xfd   : > { %v602_v13 = vpack.c.bf16 %v582_v12, %v581_v9  ;;  %v565_v21 = vmax.f32 %v495_v14, 0.0  ;;  %v2176_v9 = vmov 256.0   ;;  %v796_v10 = vrot.slane %v795_v41, 4 }
  0xfe   : > { %1914 = vrcp.f32 %v2176_v9 }
  0xff   : > { %1778 = vmatmul.msk.bf16.gmra.mxu2 %vm627_vm0, %v602_v13  ;;  %v797_v20 = vadd.f32 %v796_v10, %v795_v41 }
 0x100   : > { %v539_v18 = vpop.f32.mrf.mxu3 }
 0x101   : > { %v540_v16 = vadd.f32 %v2438_v2, %v539_v18  ;;  %v798_v25 = vrot.slane %v797_v20, 2 }
 0x102   : > { %v496_v19 = vpop.f32.mrf.mxu0 }
 0x103   : > { %v497_v11 = vadd.f32 %v2438_v2, %v496_v19  ;;  %v583_v36 = vmax.f32 %v540_v16, 0.0 }
 0x104   : > { %v1915_v14 = vpop.eup %1914 }
 0x105   : > { %v566_v24 = vmax.f32 %v497_v11, 0.0  ;;  %vm807_vm1 = vweird.f32 %v1915_v14 }
 0x107   : > { %v594_v26 = vpack.c.bf16 %v566_v24, %v565_v21  ;;  %v803_v21 = vmul.f32 256.0, %v1915_v14 }
 0x108   : > { %v541_v30 = vpop.f32.mrf.mxu3 }
 0x109   : > { %v542_v31 = vadd.f32 %v2438_v2, %v541_v30  ;;  %1770 = vmatmul.msk.bf16.gmra.mxu1 %vm627_vm0, %v594_v26  ;;  %v804_v26 = vsub.f32 1.0, %v803_v21 }
 0x10a   : > { %v499_v32 = vpop.f32.mrf.mxu0 }
 0x10b   : > { %v584_v37 = vmax.f32 %v542_v31, 0.0  ;;  %v500_v42 = vadd.f32 %v2438_v2, %v499_v32 }
 0x10d   : > { %v603_v17 = vpack.c.bf16 %v584_v37, %v583_v36  ;;  %v567_v49 = vmax.f32 %v500_v42, 0.0  ;;  %v799_v36 = vadd.f32 %v798_v25, %v797_v20  ;;  %v805_v37 = vmul.f32 %v1915_v14, %v804_v26  ;;  %v895_v26 = vld [vmem:[%s3929_s8] sm:$0x1] }
 0x10f   : > { %1779 = vmatmul.msk.bf16.gmra.mxu2 %vm627_vm0, %v603_v17  ;;  %v800_v22 = vrot.slane %v799_v36, 1  ;;  %v806_v42 = vadd.f32 %v1915_v14, %v805_v37 }
 0x110   : > { %v544_v43 = vpop.f32.mrf.mxu3 }
 0x111   : > { %v545_v51 = vadd.f32 %v2438_v2, %v544_v43 }
 0x112   : > { %v501_v39 = vpop.f32.mrf.mxu0 }
 0x113   : > { %v502_v23 = vadd.f32 %v2438_v2, %v501_v39  ;;  %v585_v56 = vmax.f32 %v545_v51, 0.0 }
 0x115   : > { %v568_v50 = vmax.f32 %v502_v23, 0.0  ;;  %v808_v23 = vsel %vm807_vm1, %v1915_v14, %v806_v42 }
 0x117   : > { %v595_v44 = vpack.c.bf16 %v568_v50, %v567_v49  ;;  %v801_v49 = vadd.f32 %v800_v22, %v799_v36 }
 0x118   : > { %v546_v45 = vpop.f32.mrf.mxu3 }
 0x119   : > { %v547_v55 = vadd.f32 %v2438_v2, %v546_v45  ;;  %1771 = vmatmul.msk.bf16.gmra.mxu1 %vm627_vm0, %v595_v44  ;;  %v809_v44 = vmul.f32 %v808_v23, %v801_v49 }
 0x11a   : > { %v504_v29 = vpop.f32.mrf.mxu0 }
 0x11b   : > { %v586_v57 = vmax.f32 %v547_v55, 0.0  ;;  %v505_v59 = vadd.f32 %v2438_v2, %v504_v29  ;;  %v810_v45 = vpack.c.bf16 %v809_v44, %v809_v44 }
 0x11d   : > { %v604_v53 = vpack.c.bf16 %v586_v57, %v585_v56  ;;  %v569_v0 = vmax.f32 %v505_v59, 0.0 }
 0x11f   : > { %1780 = vmatmul.msk.bf16.gmra.mxu2 %vm627_vm0, %v604_v53 }
 0x120   : > { %v549_v63 = vpop.f32.mrf.mxu3 }
 0x121   : > { %v550_v5 = vadd.f32 %v2438_v2, %v549_v63  ;;  %v1848_v63 = vld [vmem:[%s3928_s7] sm:$0xff] }
 0x122   : > { %v506_v34 = vpop.f32.mrf.mxu0  ;;  %918 = vmatpush.bf16.msrb.mxu3 %v1848_v63 }
 0x123   : > { %v507_v1 = vadd.f32 %v2438_v2, %v506_v34  ;;  %v587_v61 = vmax.f32 %v550_v5, 0.0 }
 0x125   : > { %v570_v4 = vmax.f32 %v507_v1, 0.0 }
 0x127   : > { %v596_v54 = vpack.c.bf16 %v570_v4, %v569_v0 }
 0x128   : > { %v551_v6 = vpop.f32.mrf.mxu3 }
 0x129   : > { %v552_v40 = vadd.f32 %v2438_v2, %v551_v6  ;;  %1772 = vmatmul.msk.bf16.gmra.mxu1 %vm627_vm0, %v596_v54 }
 0x12a   : > { %v509_v7 = vpop.f32.mrf.mxu0 }
 0x12b   : > { %v588_v8 = vmax.f32 %v552_v40, 0.0  ;;  %v510_v13 = vadd.f32 %v2438_v2, %v509_v7 }
 0x12d   : > { %v605_v12 = vpack.c.bf16 %v588_v8, %v587_v61  ;;  %v571_v18 = vmax.f32 %v510_v13, 0.0 }
 0x12f   : > { %1781 = vmatmul.msk.bf16.gmra.mxu2 %vm627_vm0, %v605_v12 }
 0x130   : > { %v554_v46 = vpop.f32.mrf.mxu3 }
 0x131   : > { %v555_v24 = vadd.f32 %v2438_v2, %v554_v46 }
 0x132   : > { %v511_v15 = vpop.f32.mrf.mxu0 }
 0x133   : > { %v512_v19 = vadd.f32 %v2438_v2, %v511_v15  ;;  %v589_v32 = vmax.f32 %v555_v24, 0.0 }
 0x135   : > { %v572_v11 = vmax.f32 %v512_v19, 0.0 }
 0x137   : > { %v597_v47 = vpack.c.bf16 %v572_v11, %v571_v18 }
 0x138   : > { %v556_v16 = vpop.f32.mrf.mxu3 }
 0x139   : > { %v557_v30 = vadd.f32 %v2438_v2, %v556_v16  ;;  %1773 = vmatmul.msk.bf16.gmra.mxu1 %vm627_vm0, %v597_v47  ;;  %v2546_v16 = vld [vmem:[%s3925_s4] ss:$0 sm:$0xff] }
 0x13a   : > { %v514_v31 = vpop.f32.mrf.mxu0 }
 0x13b   : > { %v590_v33 = vmax.f32 %v557_v30, 0.0  ;;  %v515_v38 = vadd.f32 %v2438_v2, %v514_v31 }
 0x13d   : > { %v606_v17 = vpack.c.bf16 %v590_v33, %v589_v32  ;;  %v573_v39 = vmax.f32 %v515_v38, 0.0 }
 0x13f   : > { %1782 = vmatmul.msk.bf16.gmra.mxu2 %vm627_vm0, %v606_v17 }
 0x142   : > { %v516_v43 = vpop.f32.mrf.mxu0 }
 0x143   : > { %v517_v48 = vadd.f32 %v2438_v2, %v516_v43 }
 0x145   : > { %v574_v50 = vmax.f32 %v517_v48, 0.0 }
 0x147   : > { %v598_v51 = vpack.c.bf16 %v574_v50, %v573_v39 }
 0x149   : > { %1774 = vmatmul.msk.bf16.gmra.mxu1 %vm627_vm0, %v598_v51 }
 0x14a   : > { %v519_v52 = vpop.f32.mrf.mxu0 }
 0x14b   : > { %v520_v55 = vadd.f32 %v2438_v2, %v519_v52 }
 0x14d   : > { %v575_v56 = vmax.f32 %v520_v55, 0.0 }
 0x14f   : > { %884 = vmatmul.bf16.vlgmr.msrb.gmra.mxu2 %v810_v45 }
 0x152   : > { %v521_v29 = vpop.f32.mrf.mxu0 }
 0x153   : > { %v522_v57 = vadd.f32 %v2438_v2, %v521_v29 }
 0x155   : > { %v576_v58 = vmax.f32 %v522_v57, 0.0 }
 0x156   : > { %v685_v35 = vpop.f32.mrf.mxu1 }
 0x157   : > { %v599_v53 = vpack.c.bf16 %v576_v58, %v575_v56  ;;  %v686_v31 = vadd.f32 %v2546_v16, %v685_v35 }
 0x159   : > { %1775 = vmatmul.msk.bf16.gmra.mxu1 %vm627_vm0, %v599_v53 }
 0x15e   : > { %v687_v6 = vpop.f32.mrf.mxu1 }
 0x15f   : > { %v688_v33 = vadd.f32 %v2546_v16, %v687_v6 }
 0x166   : > { %v690_v61 = vpop.f32.mrf.mxu1 }
 0x167   : > { %v691_v36 = vadd.f32 %v2546_v16, %v690_v61 }
 0x169   : > { %1776 = vmatmul.msk.bf16.gmra.mxu1 %vm627_vm0, %v2448_v27  ;;  %v827_v27 = vld [vmem:[%s3927_s6] sm:$0x1] }
 0x16e   : > { %v692_v13 = vpop.f32.mrf.mxu1 }
 0x16f   : > { %v693_v37 = vadd.f32 %v2546_v16, %v692_v13 }
 0x172   : > { %v735_v59 = vpop.f32.mrf.mxu2 }
 0x173   : > { %v736_v17 = vadd.f32 %v2546_v16, %v735_v59 }
 0x176   : > { %v695_v10 = vpop.f32.mrf.mxu1 }
 0x177   : > { %v696_v38 = vadd.f32 %v2546_v16, %v695_v10 }
 0x17a   : > { %v737_v62 = vpop.f32.mrf.mxu2 }
 0x17b   : > { %v738_v22 = vadd.f32 %v2546_v16, %v737_v62 }
 0x17e   : > { %v697_v46 = vpop.f32.mrf.mxu1 }
 0x17f   : > { %v698_v42 = vadd.f32 %v2546_v16, %v697_v46 }
 0x182   : > { %v740_v34 = vpop.f32.mrf.mxu2 }
 0x183   : > { %v741_v57 = vadd.f32 %v2546_v16, %v740_v34 }
 0x186   : > { %v700_v14 = vpop.f32.mrf.mxu1 }
 0x187   : > { %v701_v48 = vadd.f32 %v2546_v16, %v700_v14 }
 0x18a   : > { %v742_v0 = vpop.f32.mrf.mxu2 }
 0x18b   : > { %v743_v58 = vadd.f32 %v2546_v16, %v742_v0 }
 0x18e   : > { %v702_v15 = vpop.f32.mrf.mxu1 }
 0x18f   : > { %v703_v49 = vadd.f32 %v2546_v16, %v702_v15 }
 0x192   : > { %v745_v1 = vpop.f32.mrf.mxu2 }
 0x193   : > { %v746_v62 = vadd.f32 %v2546_v16, %v745_v1 }
 0x196   : > { %v705_v18 = vpop.f32.mrf.mxu1 }
 0x197   : > { %v706_v23 = vadd.f32 %v2546_v16, %v705_v18 }
 0x19a   : > { %v747_v3 = vpop.f32.mrf.mxu2 }
 0x19b   : > { %v748_v63 = vadd.f32 %v2546_v16, %v747_v3 }
 0x19e   : > { %v707_v19 = vpop.f32.mrf.mxu1 }
 0x19f   : > { %v708_v50 = vadd.f32 %v2546_v16, %v707_v19 }
 0x1a2   : > { %v750_v4 = vpop.f32.mrf.mxu2 }
 0x1a3   : > { %v751_v35 = vadd.f32 %v2546_v16, %v750_v4 }
 0x1a6   : > { %v710_v20 = vpop.f32.mrf.mxu1 }
 0x1a7   : > { %v711_v15 = vadd.f32 %v2546_v16, %v710_v20 }
 0x1aa   : > { %v752_v2 = vpop.f32.mrf.mxu2 }
 0x1ab   : > { %v753_v6 = vadd.f32 %v2546_v16, %v752_v2 }
 0x1ae   : > { %v712_v21 = vpop.f32.mrf.mxu1 }
 0x1af   : > { %v713_v19 = vadd.f32 %v2546_v16, %v712_v21 }
 0x1b2   : > { %v755_v5 = vpop.f32.mrf.mxu2 }
 0x1b6   : > { %v715_v11 = vpop.f32.mrf.mxu1 }
 0x1ba   : > { %v757_v54 = vpop.f32.mrf.mxu2 }
 0x1bb   : > { %v758_v34 = vadd.f32 %v2546_v16, %v757_v54 }
 0x1be   : > { %v717_v24 = vpop.f32.mrf.mxu1 }
 0x1c2   : > { %v760_v60 = vpop.f32.mrf.mxu2 }
 0x1c3   : > { %v761_v0 = vadd.f32 %v2546_v16, %v760_v60 }
 0x1c6   : > { %v2539_v47 = vpop.f32.mrf.mxu1 }
 0x1ca   : > { %v762_v40 = vpop.f32.mrf.mxu2 }
 0x1cb   : > { %v763_v61 = vadd.f32 %v2546_v16, %v762_v40 }
 0x1ce   : > { %v2541_v25 = vpop.f32.mrf.mxu1 }
 0x1d2   : > { %v885_v7 = vpop.f32.mrf.mxu2 }
 0x1d3   : > { %v886_v8 = vadd.f32 %v885_v7, %v827_v27  ;;  %v756_v7 = vadd.f32 %v2546_v16, %v755_v5 }
 0x1d5   : > { %v889_v41 = vmax.f32 %v886_v8, 0.0 }
 0x1d6   : > { %v725_v43 = vpop.f32.mrf.mxu1 }
 0x1d7   : > { %v890_v9 = vpack.c.bf16 %v889_v41, %v889_v41 }
 0x1d9   : > { %1823 = vmatmul.msk.bf16.vlgmr.msrb.gmra.mxu3 %vm627_vm0, %v890_v9 }
 0x1da   : > { %v887_v12 = vpop.f32.mrf.mxu2 }
 0x1de   : > { %v727_v13 = vpop.f32.mrf.mxu1 }
 0x1df   : > { %v728_v20 = vadd.f32 %v2546_v16, %v727_v13 }
 0x1e6   : > { %v730_v10 = vpop.f32.mrf.mxu1 }
 0x25c   : > { %v920_v30 = vpop.f32.mrf.mxu3 }
 0x25d   : > { %v921_v32 = vadd.f32 %v920_v30, %v895_v26  ;;  %v716_v26 = vadd.f32 %v2546_v16, %v715_v11  ;;  %v718_v30 = vadd.f32 %v2546_v16, %v717_v24  ;;  %v731_v11 = vadd.f32 %v2546_v16, %v730_v10 }
 0x25f   : > { %v2559_v39 = vperm.slane %v921_v32, 0  ;;  %v721_v32 = vadd.f32 %v2546_v16, %v2539_v47 }
 0x261   : > { %v925_v51 = vadd.f32 %v2559_v39, %v686_v31  ;;  %v926_v44 = vadd.f32 %v2559_v39, %v688_v33  ;;  %v927_v28 = vadd.f32 %v2559_v39, %v691_v36  ;;  %v928_v52 = vadd.f32 %v2559_v39, %v693_v37  ;;  %v732_v36 = vpop.f32.mrf.mxu1 }
 0x262   : > { %v929_v45 = vadd.f32 %v2559_v39, %v696_v38  ;;  %v930_v55 = vadd.f32 %v2559_v39, %v698_v42  ;;  %v2572_v29 = vadd.f32 %v2559_v39, %v701_v48  ;;  %v2575_v56 = vadd.f32 %v2559_v39, %v703_v49 }
 0x263   : > { %v2580_v53 = vadd.f32 %v2559_v39, %v706_v23  ;;  %v2583_v59 = vadd.f32 %v2559_v39, %v708_v50  ;;  %v2594_v8 = vadd.f32 %v2559_v39, %v736_v17  ;;  %v2597_v1 = vadd.f32 %v2559_v39, %v738_v22 }
 0x264   : > { %v922_v27 = vpop.f32.mrf.mxu3  ;;  %v2600_v3 = vadd.f32 %v2559_v39, %v741_v57  ;;  %v2603_v4 = vadd.f32 %v2559_v39, %v743_v58  ;;  %v2606_v2 = vadd.f32 %v2559_v39, %v746_v62  ;;  %v2609_v5 = vadd.f32 %v2559_v39, %v748_v63 }
 0x265   : > { %v2612_v54 = vadd.f32 %v2559_v39, %v751_v35  ;;  %v2615_v60 = vadd.f32 %v2559_v39, %v753_v6  ;;  %v2618_v40 = vadd.f32 %v2559_v39, %v756_v7  ;;  %v2621_v41 = vadd.f32 %v2559_v39, %v758_v34 }
 0x266   : > { %v2624_v9 = vadd.f32 %v2559_v39, %v761_v0  ;;  %v2627_v12 = vadd.f32 %v2559_v39, %v763_v61  ;;  %v957_v46 = vsub.f32 0.0, %v925_v51  ;;  %v958_v14 = vsub.f32 0.0, %v926_v44 }
 0x267   : > { %v959_v18 = vsub.f32 0.0, %v927_v28  ;;  %v960_v31 = vsub.f32 0.0, %v928_v52  ;;  %v723_v33 = vadd.f32 %v2546_v16, %v2541_v25  ;;  %v961_v37 = vsub.f32 0.0, %v929_v45 }
 0x268   : > { %v989_v17 = vmul.f32 1.442695, %v957_v46  ;;  %v726_v38 = vadd.f32 %v2546_v16, %v725_v43  ;;  %v962_v22 = vsub.f32 0.0, %v930_v55  ;;  %v991_v21 = vmul.f32 1.442695, %v958_v14 }
 0x269   : > { %v935_v24 = vadd.f32 %v2559_v39, %v711_v15  ;;  %v963_v42 = vsub.f32 0.0, %v2572_v29  ;;  %v993_v48 = vmul.f32 1.442695, %v959_v18  ;;  %v733_v47 = vadd.f32 %v2546_v16, %v732_v36 }
 0x26a   : > { %v936_v25 = vadd.f32 %v2559_v39, %v713_v19  ;;  %v964_v49 = vsub.f32 0.0, %v2575_v56  ;;  %v995_v23 = vmul.f32 1.442695, %v960_v31  ;;  %v937_v43 = vadd.f32 %v2559_v39, %v716_v26 }
 0x26b   : > { %v965_v50 = vsub.f32 0.0, %v2580_v53  ;;  %1916 = vpow2.f32 %v989_v17  ;;  %v997_v51 = vmul.f32 1.442695, %v961_v37  ;;  %v938_v44 = vadd.f32 %v2559_v39, %v718_v30 }
 0x26c   : > { %v966_v28 = vsub.f32 0.0, %v2583_v59  ;;  %1918 = vpow2.f32 %v991_v21  ;;  %v999_v52 = vmul.f32 1.442695, %v962_v22  ;;  %v939_v45 = vadd.f32 %v2559_v39, %v721_v32 }
 0x26d   : > { %v967_v16 = vsub.f32 0.0, %v935_v24  ;;  %1920 = vpow2.f32 %v993_v48  ;;  %v1001_v55 = vmul.f32 1.442695, %v963_v42  ;;  %v940_v29 = vadd.f32 %v2559_v39, %v723_v33 }
 0x26e   : > { %v968_v56 = vsub.f32 0.0, %v936_v25  ;;  %1922 = vpow2.f32 %v995_v23  ;;  %v1003_v57 = vmul.f32 1.442695, %v964_v49  ;;  %v941_v58 = vadd.f32 %v2559_v39, %v726_v38 }
 0x26f   : > { %v969_v53 = vsub.f32 0.0, %v937_v43  ;;  %1924 = vpow2.f32 %v997_v51  ;;  %v1005_v62 = vmul.f32 1.442695, %v965_v50  ;;  %v942_v63 = vadd.f32 %v2559_v39, %v728_v20 }
 0x270   : > { %v970_v59 = vsub.f32 0.0, %v938_v44  ;;  %1926 = vpow2.f32 %v999_v52  ;;  %v1007_v35 = vmul.f32 1.442695, %v966_v28  ;;  %v943_v27 = vadd.f32 %v2559_v39, %v731_v11 }
 0x271   : > { %v1917_v6 = vpop.eup %1916  ;;  %v971_v7 = vsub.f32 0.0, %v939_v45  ;;  %1928 = vpow2.f32 %v1001_v55  ;;  %v1009_v34 = vmul.f32 1.442695, %v967_v16  ;;  %v944_v61 = vadd.f32 %v2559_v39, %v733_v47 }
 0x272   : > { %v1919_v0 = vpop.eup %1918  ;;  %v972_v13 = vsub.f32 0.0, %v940_v29  ;;  %1930 = vpow2.f32 %v1003_v57  ;;  %v1011_v10 = vmul.f32 1.442695, %v968_v56  ;;  %v973_v14 = vsub.f32 0.0, %v941_v58 }
 0x273   : > { %v2655_v46 = vpop.eup %1920  ;;  %1932 = vpow2.f32 %v1005_v62  ;;  %v1013_v15 = vmul.f32 1.442695, %v969_v53  ;;  %v974_v19 = vsub.f32 0.0, %v942_v63  ;;  %v1015_v26 = vmul.f32 1.442695, %v970_v59 }
 0x274   : > { %v2657_v18 = vpop.eup %1922  ;;  %1934 = vpow2.f32 %v1007_v35  ;;  %v975_v31 = vsub.f32 0.0, %v943_v27  ;;  %v1017_v32 = vmul.f32 1.442695, %v971_v7  ;;  %v976_v39 = vsub.f32 0.0, %v944_v61 }
 0x275   : > { %v2659_v30 = vpop.eup %1924  ;;  %1936 = vpow2.f32 %v1009_v34  ;;  %v1019_v36 = vmul.f32 1.442695, %v972_v13  ;;  %v977_v17 = vsub.f32 0.0, %v2594_v8  ;;  %v1021_v38 = vmul.f32 1.442695, %v973_v14 }
 0x276   : > { %v2661_v33 = vpop.eup %1926  ;;  %1938 = vpow2.f32 %v1011_v10  ;;  %v978_v22 = vsub.f32 0.0, %v2597_v1  ;;  %v1023_v21 = vmul.f32 1.442695, %v974_v19  ;;  %v979_v24 = vsub.f32 0.0, %v2600_v3 }
 0x277   : > { %v2663_v37 = vpop.eup %1928  ;;  %1940 = vpow2.f32 %v1013_v15  ;;  %v1025_v42 = vmul.f32 1.442695, %v975_v31  ;;  %v980_v47 = vsub.f32 0.0, %v2603_v4  ;;  %v1027_v8 = vmul.f32 1.442695, %v976_v39 }
 0x278   : > { %v2666_v20 = vpop.eup %1930  ;;  %1942 = vpow2.f32 %v1015_v26  ;;  %v981_v49 = vsub.f32 0.0, %v2606_v2  ;;  %v1029_v1 = vmul.f32 1.442695, %v977_v17  ;;  %v982_v43 = vsub.f32 0.0, %v2609_v5 }
 0x279   : > { %v2669_v11 = vpop.eup %1932  ;;  %1944 = vpow2.f32 %v1017_v32  ;;  %v983_v3 = vsub.f32 0.0, %v2612_v54  ;;  %v1031_v50 = vmul.f32 1.442695, %v978_v22  ;;  %v984_v4 = vsub.f32 0.0, %v2615_v60 }
 0x27a   : > { %v2672_v48 = vpop.eup %1934  ;;  %1946 = vpow2.f32 %v1019_v36  ;;  %v985_v44 = vsub.f32 0.0, %v2618_v40  ;;  %v1033_v28 = vmul.f32 1.442695, %v979_v24  ;;  %v986_v2 = vsub.f32 0.0, %v2621_v41 }
 0x27b   : > { %v2675_v25 = vpop.eup %1936  ;;  %1948 = vpow2.f32 %v1021_v38  ;;  %v1035_v45 = vmul.f32 1.442695, %v980_v47  ;;  %v2689_v16 = vadd.f32 1.0, %v1917_v6  ;;  %v987_v54 = vsub.f32 0.0, %v2624_v9 }
 0x27c   : > { %v2678_v23 = vpop.eup %1938  ;;  %1950 = vpow2.f32 %v1023_v21  ;;  %v1037_v55 = vmul.f32 1.442695, %v981_v49  ;;  %v2694_v29 = vadd.f32 1.0, %v1919_v0  ;;  %v988_v40 = vsub.f32 0.0, %v2627_v12 }
 0x27d   : > { %v2682_v51 = vpop.eup %1940  ;;  %1952 = vpow2.f32 %v1025_v42  ;;  %v1039_v56 = vmul.f32 1.442695, %v982_v43  ;;  %v1041_v41 = vmul.f32 1.442695, %v983_v3  ;;  %v1043_v58 = vmul.f32 1.442695, %v984_v4 }
 0x27e   : > { %v2686_v52 = vpop.eup %1942  ;;  %1954 = vpow2.f32 %v1027_v8  ;;  %v1045_v53 = vmul.f32 1.442695, %v985_v44  ;;  %v2697_v63 = vmul.f32 1.442695, %v986_v2  ;;  %v2700_v9 = vadd.f32 1.0, %v2655_v46 }
 0x27f   : > { %v2691_v5 = vpop.eup %1944  ;;  %1956 = vpow2.f32 %v1029_v1  ;;  %v1096_v59 = vand.u32 2147483648, %v2689_v16  ;;  %v2703_v6 = vmul.f32 1.442695, %v987_v54  ;;  %v2706_v12 = vadd.f32 1.0, %v2657_v18 }
 0x280   : > { %v1947_v60 = vpop.eup %1946  ;;  %1958 = vpow2.f32 %v1031_v50  ;;  %v1111_v27 = vand.u32 2147483648, %v2694_v29  ;;  %v2709_v34 = vmul.f32 1.442695, %v988_v40  ;;  %v2712_v0 = vadd.f32 1.0, %v2659_v30 }
 0x281   : > { %v1949_v57 = vpop.eup %1948  ;;  %1960 = vpow2.f32 %v1033_v28  ;;  %v2716_v10 = vadd.f32 1.0, %v2661_v33  ;;  %v2719_v46 = vadd.f32 1.0, %v2663_v37  ;;  %v2723_v18 = vadd.f32 1.0, %v2666_v20 }
 0x282   : > { %v1951_v62 = vpop.eup %1950  ;;  %1962 = vpow2.f32 %v1035_v45  ;;  %v2725_v19 = vor.u32 1.1754944e-38, %v1096_v59  ;;  %v1126_v26 = vand.u32 2147483648, %v2700_v9  ;;  %v2729_v31 = vadd.f32 1.0, %v2669_v11 }
 0x283   : > { %v1953_v35 = vpop.eup %1952  ;;  %1964 = vpow2.f32 %v1037_v55  ;;  %v2732_v32 = vor.u32 1.1754944e-38, %v1111_v27  ;;  %v1141_v33 = vand.u32 2147483648, %v2706_v12  ;;  %v2736_v36 = vadd.f32 1.0, %v2672_v48 }
 0x284   : > { %v1955_v7 = vpop.eup %1954  ;;  %1966 = vpow2.f32 %v1039_v56  ;;  %v2739_v37 = vadd.f32 1.0, %v2675_v25  ;;  %v2744_v20 = vadd.f32 1.0, %v2678_v23  ;;  %v1156_v21 = vand.u32 2147483648, %v2712_v0 }
 0x285   : > { %v1957_v13 = vpop.eup %1956  ;;  %1968 = vpow2.f32 %v1041_v41  ;;  %v2750_v24 = vadd.f32 1.0, %v2682_v51  ;;  %v2752_v42 = vor.u32 1.1754944e-38, %v1126_v26  ;;  %v1171_v48 = vand.u32 2147483648, %v2716_v10 }
 0x286   : > { %v1959_v15 = vpop.eup %1958  ;;  %1970 = vpow2.f32 %v1043_v58  ;;  %v2756_v8 = vadd.f32 1.0, %v2686_v52  ;;  %v2759_v25 = vor.u32 1.1754944e-38, %v1141_v33  ;;  %v2763_v23 = vadd.f32 1.0, %v2691_v5 }
 0x287   : > { %v1961_v30 = vpop.eup %1960  ;;  %1972 = vrcp.f32 %v2689_v16  ;;  %v2765_v43 = vadd.f32 1.0, %v1947_v60  ;;  %v2771_v51 = vadd.f32 1.0, %v1949_v57  ;;  %v2773_v4 = vor.u32 1.1754944e-38, %v1156_v21 }
 0x288   : > { %v1963_v39 = vpop.eup %1962  ;;  %1974 = vrcp.f32 %v2694_v29  ;;  %v1186_v44 = vand.u32 2147483648, %v2719_v46  ;;  %v2779_v52 = vadd.f32 1.0, %v1951_v62  ;;  %v2781_v2 = vadd.f32 1.0, %v1953_v35 }
 0x289   : > { %v1965_v38 = vpop.eup %1964  ;;  %1976 = vrcp.f32 %v2700_v9  ;;  %v2783_v45 = vor.u32 1.1754944e-38, %v1171_v48  ;;  %v2789_v54 = vadd.f32 1.0, %v1955_v7  ;;  %v1201_v60 = vand.u32 2147483648, %v2723_v18 }
 0x28a   : > { %v1967_v11 = vpop.eup %1966  ;;  %1978 = vpow2.f32 %v1045_v53  ;;  %v2794_v56 = vadd.f32 1.0, %v1957_v13  ;;  %v2796_v57 = vadd.f32 1.0, %v1959_v15  ;;  %v2810_v35 = vadd.f32 1.0, %v1961_v30 }
 0x28b   : > { %v1969_v47 = vpop.eup %1968  ;;  %1980 = vrcp.f32 %v2706_v12  ;;  %v1216_v27 = vand.u32 2147483648, %v2729_v31  ;;  %v2820_v13 = vor.u32 1.1754944e-38, %v1201_v60  ;;  %v2826_v30 = vadd.f32 1.0, %v1965_v38 }
 0x28c   : > { %v1971_v1 = vpop.eup %1970  ;;  %1982 = vrcp.f32 %v2712_v0  ;;  %3952 = vst [vmem:[#allocation11_spill] sm:$0xff] %v2796_v57  ;;  %v2828_v33 = vadd.f32 1.0, %v1967_v11  ;;  %v1231_v21 = vand.u32 2147483648, %v2736_v36  ;;  %vm1090_vm2 = vweird.f32 %v2689_v16 }
 0x28d   : > { %v2769_v50 = vpop.eup %1972  ;;  %1984 = vrcp.f32 %v2716_v10  ;;  %3953 = vst [vmem:[#allocation12_spill] sm:$0xff] %v2810_v35  ;;  %v2839_v11 = vor.u32 1.1754944e-38, %v1216_v27  ;;  %v2843_v22 = vadd.f32 1.0, %v1971_v1  ;;  %vm1105_vm3 = vweird.f32 %v2694_v29 }
 0x28e   : > { %v2777_v28 = vpop.eup %1974  ;;  %1986 = vrcp.f32 %v2719_v46  ;;  %v1086_v53 = vmul.f32 %v2769_v50, %v2689_v16  ;;  %3955 = vst [vmem:[#allocation14_spill] sm:$0xff] %v2826_v30  ;;  %v2857_v27 = vor.u32 1.1754944e-38, %v1231_v21  ;;  %vm1120_vm4 = vweird.f32 %v2700_v9 }
 0x28f   : > { %v2786_v5 = vpop.eup %1976  ;;  %1988 = vpow2.f32 %v2697_v63  ;;  %v1101_v62 = vmul.f32 %v2777_v28, %v2694_v29  ;;  %v2806_v63 = vor.u32 1.1754944e-38, %v1186_v44  ;;  %3956 = vst [vmem:[#allocation15_spill] sm:$0xff] %v2828_v33  ;;  %v2832_v44 = vadd.f32 1.0, %v1969_v47 }
 0x290   : > { %v1979_v40 = vpop.eup %1978  ;;  %1990 = vpow2.f32 %v2703_v6  ;;  %v1116_v6 = vmul.f32 %v2786_v5, %v2700_v9  ;;  %3958 = vst [vmem:[#allocation17_spill] sm:$0xff] %v2843_v22  ;;  %vm1135_vm5 = vweird.f32 %v2706_v12  ;;  %vm1150_vm6 = vweird.f32 %v2712_v0 }
 0x291   : > { %v2799_v58 = vpop.eup %1980  ;;  %1992 = vpow2.f32 %v2709_v34  ;;  %v2818_v34 = vadd.f32 1.0, %v1963_v39  ;;  %3957 = vst [vmem:[#allocation16_spill] sm:$0xff] %v2832_v44  ;;  %v1087_v39 = vsub.f32 1.0, %v1086_v53  ;;  %v1102_v60 = vsub.f32 1.0, %v1101_v62 }
 0x292   : > { %v2808_v59 = vpop.eup %1982  ;;  %1994 = vrcp.f32 %v2723_v18  ;;  %v1117_v3 = vsub.f32 1.0, %v1116_v6  ;;  %v1131_v15 = vmul.f32 %v2799_v58, %v2706_v12  ;;  %v2845_v47 = vadd.f32 1.0, %v1979_v40 }
 0x293   : > { %v2816_v7 = vpop.eup %1984  ;;  %3954 = vst [vmem:[#allocation13_spill] sm:$0xff] %v2818_v34  ;;  %1996 = vrcp.f32 %v2729_v31  ;;  %v1146_v38 = vmul.f32 %v2808_v59, %v2712_v0  ;;  %v1088_v14 = vmul.f32 %v2769_v50, %v1087_v39  ;;  %v1103_v61 = vmul.f32 %v2777_v28, %v1102_v60 }
 0x294   : > { %v2824_v26 = vpop.eup %1986  ;;  %1998 = vrcp.f32 %v2736_v36  ;;  %3959 = vst [vmem:[#allocation18_spill] sm:$0xff] %v2845_v47  ;;  %v1161_v53 = vmul.f32 %v2816_v7, %v2716_v10  ;;  %v1118_v21 = vmul.f32 %v2786_v5, %v1117_v3  ;;  %v1132_v47 = vsub.f32 1.0, %v1131_v15 }
 0x295   : > { %v1989_v48 = vpop.eup %1988  ;;  %v1176_v62 = vmul.f32 %v2824_v26, %v2719_v46  ;;  %2000 = vrcp.f32 %v2739_v37  ;;  %v1147_v1 = vsub.f32 1.0, %v1146_v38  ;;  %vm1091_vm7 = vweird.f32 %v2769_v50 }
 0x296   : > { %v1991_v55 = vpop.eup %1990  ;;  %v2854_v41 = vadd.f32 1.0, %v1989_v48  ;;  %v3962_v48 = vand.u32 2147483647, %v2689_v16  ;;  %vm1106_vm9 = vweird.f32 %v2777_v28  ;;  %v3965_v15 = vand.u32 2147483647, %v2694_v29  ;;  %vm2921_vm0 = vmor %vm1090_vm2, %vm1091_vm7 }
 0x297   : > { %v2841_v49 = vpop.eup %1992  ;;  %v2863_v17 = vadd.f32 1.0, %v1991_v55  ;;  %v1162_v55 = vsub.f32 1.0, %v1161_v53  ;;  %v1177_v39 = vsub.f32 1.0, %v1176_v62  ;;  %vm1121_vm11 = vweird.f32 %v2786_v5  ;;  %vm2935_vm12 = vmor %vm1105_vm3, %vm1106_vm9 }
 0x298   : > { %v2852_v6 = vpop.eup %1994  ;;  %3960 = vst [vmem:[#allocation19_spill] sm:$0xff] %v2854_v41  ;;  %vm2881_vm8 = vcmp.eq.f32.partialorder %v3962_v48, 8.507059e+37  ;;  %vm2888_vm10 = vcmp.eq.f32.partialorder %v3965_v15, 8.507059e+37  ;;  %v1089_v62 = vadd.f32 %v2769_v50, %v1088_v14  ;;  %v1104_v48 = vadd.f32 %v2777_v28, %v1103_v61  ;;  %vm2962_vm3 = vmor %vm1120_vm4, %vm1121_vm11 }
 0x299   : > { %v2861_v40 = vpop.eup %1996  ;;  %3961 = vst [vmem:[#allocation20_spill] sm:$0xff] %v2863_v17  ;;  %v1191_v60 = vmul.f32 %v2852_v6, %v2723_v18  ;;  %v1261_v17 = vand.u32 2147483648, %v2744_v20  ;;  %v3968_v22 = vand.u32 2147483647, %v2700_v9  ;;  %vm1136_vm14 = vweird.f32 %v2799_v58 }
 0x29a   : > { %v2869_v41 = vpop.eup %1998  ;;  %v1206_v53 = vmul.f32 %v2861_v40, %v2729_v31  ;;  %v1119_v30 = vadd.f32 %v2786_v5, %v1118_v21  ;;  %v1133_v14 = vmul.f32 %v2799_v58, %v1132_v47  ;;  %v1148_v61 = vmul.f32 %v2808_v59, %v1147_v1  ;;  %vm2983_vm4 = vmor %vm1135_vm5, %vm1136_vm14 }
 0x29b   : > { %vm2900_vm13 = vcmp.eq.f32.partialorder %v3968_v22, 8.507059e+37  ;;  %v1221_v15 = vmul.f32 %v2869_v41, %v2736_v36  ;;  %v2908_v33 = vpop.eup %2000  ;;  %2002 = vrcp.f32 %v2744_v20  ;;  %v1163_v22 = vmul.f32 %v2816_v7, %v1162_v55 }
 0x29c   : > { %v1178_v34 = vmul.f32 %v2824_v26, %v1177_v39  ;;  %v1192_v35 = vsub.f32 1.0, %v1191_v60  ;;  %2004 = vrcp.f32 %v2750_v24  ;;  %vm1151_vm1 = vweird.f32 %v2808_v59 }
 0x29d   : > { %v1207_v47 = vsub.f32 1.0, %v1206_v53  ;;  %2006 = vrcp.f32 %v2756_v8  ;;  %v1093_v1 = vsel %vm2921_vm0, %v2769_v50, %v1089_v62  ;;  %v3975_v21 = vand.u32 2147483647, %v2706_v12  ;;  %vm3006_vm5 = vmor %vm1150_vm6, %vm1151_vm1 }
 0x29e   : > { %v3978_v39 = vand.u32 2147483647, %v2712_v0  ;;  %vm1181_vm0 = vweird.f32 %v2824_v26  ;;  %vm1195_vm15 = vweird.f32 %v2723_v18  ;;  %v1222_v29 = vsub.f32 1.0, %v1221_v15 }
 0x29f   : > { %vm2941_vm2 = vcmp.eq.f32.partialorder %v3975_v21, 8.507059e+37  ;;  %v1236_v50 = vmul.f32 %v2908_v33, %v2739_v37  ;;  %v1108_v57 = vsel %vm2935_vm12, %v2777_v28, %v1104_v48  ;;  %v1134_v62 = vadd.f32 %v2799_v58, %v1133_v14 }
 0x2a0   : > { %vm2947_vm7 = vcmp.eq.f32.partialorder %v3978_v39, 8.507059e+37  ;;  %v1149_v21 = vadd.f32 %v2808_v59, %v1148_v61  ;;  %v3983_v15 = vand.u32 2147483647, %v2716_v10  ;;  %vm1210_vm12 = vweird.f32 %v2729_v31 }
 0x2a1   : > { %2008 = vrcp.f32 %v2763_v23  ;;  %v1123_v9 = vsel %vm2962_vm3, %v2786_v5, %v1119_v30  ;;  %v1164_v48 = vadd.f32 %v2816_v7, %v1163_v22  ;;  %v1179_v14 = vadd.f32 %v2824_v26, %v1178_v34  ;;  %v2997_v30 = vpop.eup %2002 }
 0x2a2   : > { %vm2970_vm9 = vcmp.eq.f32.partialorder %v3983_v15, 8.507059e+37  ;;  %v3988_v61 = vand.u32 2147483647, %v2719_v46  ;;  %v1193_v5 = vmul.f32 %v2852_v6, %v1192_v35  ;;  %v3000_v12 = vadd.f32 1.0, %v2841_v49 }
 0x2a3   : > { %v1208_v22 = vmul.f32 %v2861_v40, %v1207_v47  ;;  %v3993_v53 = vand.u32 2147483648, %v2739_v37  ;;  %v3015_v15 = vor.u32 1.1754944e-38, %v1261_v17  ;;  %v3022_v49 = vsel %vm2881_vm8, %v2725_v19, %v1093_v1 }
 0x2a4   : > { %vm2991_vm11 = vcmp.eq.f32.partialorder %v3988_v61, 8.507059e+37  ;;  %v3017_v61 = vpop.eup %2004  ;;  %v3027_v0 = vsel %vm2888_vm10, %v2732_v32, %v1108_v57  ;;  %vm3994_vm6 = vweird.f32 %v2816_v7  ;;  %vm3995_vm14 = vweird.f32 %v2716_v10 }
 0x2a5   : > { %v3013_v35 = vor.u32 1.1754944e-38, %v3993_v53  ;;  %vm3033_vm1 = vmor %vm3995_vm14, %vm3994_vm6  ;;  %v3998_v17 = vand.u32 2147483647, %v2723_v18  ;;  %v1223_v19 = vmul.f32 %v2869_v41, %v1222_v29  ;;  %v1237_v3 = vsub.f32 1.0, %v1236_v50  ;;  %v3044_v38 = vpop.eup %2006 }
 0x2a6   : > { %v3049_v32 = vsel %vm2900_vm13, %v2752_v42, %v1123_v9  ;;  %v1138_v10 = vsel %vm2983_vm4, %v2799_v58, %v1134_v62  ;;  %v1153_v1 = vsel %vm3006_vm5, %v2808_v59, %v1149_v21  ;;  %vm4001_vm8 = vweird.f32 %v2719_v46 }
 0x2a7   : > { %vm3039_vm3 = vcmp.eq.f32.partialorder %v3998_v17, 8.507059e+37  ;;  %vm3061_vm10 = vmor %vm4001_vm8, %vm1181_vm0  ;;  %vm1196_vm6 = vweird.f32 %v2852_v6  ;;  %v1168_v42 = vsel %vm3033_vm1, %v2816_v7, %v1164_v48  ;;  %v1194_v59 = vadd.f32 %v2852_v6, %v1193_v5 }
 0x2a8   : > { %v1183_v58 = vsel %vm3061_vm10, %v2824_v26, %v1179_v14  ;;  %v4004_v44 = vand.u32 2147483647, %v2729_v31  ;;  %v4007_v50 = vand.u32 2147483647, %v2736_v36  ;;  %vm1240_vm4 = vweird.f32 %v2739_v37  ;;  %v3088_v26 = vpop.eup %2008  ;;  %vm3114_vm1 = vmor %vm1195_vm15, %vm1196_vm6 }
 0x2a9   : > { %v1251_v7 = vmul.f32 %v2997_v30, %v2744_v20  ;;  %v1209_v62 = vadd.f32 %v2861_v40, %v1208_v22  ;;  %vm1211_vm5 = vweird.f32 %v2861_v40  ;;  %v1266_v21 = vmul.f32 %v3017_v61, %v2750_v24 }
 0x2aa   : > { %vm3075_vm13 = vcmp.eq.f32.partialorder %v4004_v44, 8.507059e+37  ;;  %vm3081_vm0 = vcmp.eq.f32.partialorder %v4007_v50, 8.507059e+37  ;;  %2010 = vrcp.f32 %v2765_v43  ;;  %v1224_v9 = vadd.f32 %v2869_v41, %v1223_v19 }
 0x2ab   : > { %vm1226_vm14 = vweird.f32 %v2869_v41  ;;  %v1238_v28 = vmul.f32 %v2908_v33, %v1237_v3  ;;  %v1281_v48 = vmul.f32 %v3044_v38, %v2756_v8  ;;  %v3103_v14 = vsel %vm2941_vm2, %v2759_v25, %v1138_v10  ;;  %vm3130_vm2 = vmor %vm1210_vm12, %vm1211_vm5 }
 0x2ac   : > { %v3108_v5 = vsel %vm2947_vm7, %v2773_v4, %v1153_v1  ;;  %v1276_v22 = vand.u32 2147483648, %v2750_v24  ;;  %2012 = vrcp.f32 %v2771_v51  ;;  %v3123_v25 = vsel %vm2970_vm9, %v2783_v45, %v1168_v42 }
 0x2ad   : > { %v1198_v4 = vsel %vm3114_vm1, %v2852_v6, %v1194_v59  ;;  %v4014_v55 = vand.u32 2147483647, %v2739_v37  ;;  %v1252_v47 = vsub.f32 1.0, %v1251_v7  ;;  %v1296_v45 = vmul.f32 %v3088_v26, %v2763_v23 }
 0x2ae   : > { %v3145_v6 = vsel %vm2991_vm11, %v2806_v63, %v1183_v58  ;;  %v1213_v31 = vsel %vm3130_vm2, %v2861_v40, %v1209_v62  ;;  %vm4017_vm7 = vweird.f32 %v2736_v36  ;;  %vm1241_vm12 = vweird.f32 %v2908_v33 }
 0x2af   : > { %vm3136_vm15 = vcmp.eq.f32.partialorder %v4014_v55, 8.507059e+37  ;;  %vm3154_vm9 = vmor %vm4017_vm7, %vm1226_vm14  ;;  %v1267_v17 = vsub.f32 1.0, %v1266_v21  ;;  %v1239_v16 = vadd.f32 %v2908_v33, %v1238_v28  ;;  %vm1255_vm11 = vweird.f32 %v2744_v20 }
 0x2b0   : > { %v1228_v63 = vsel %vm3154_vm9, %v2869_v41, %v1224_v9  ;;  %v1282_v40 = vsub.f32 1.0, %v1281_v48  ;;  %2014 = vrcp.f32 %v2779_v52  ;;  %v3165_v19 = vpop.eup %2010  ;;  %v3170_v36 = vsel %vm3039_vm3, %v2820_v13, %v1198_v4  ;;  %vm3196_vm3 = vmor %vm1240_vm4, %vm1241_vm12 }
 0x2b1   : > { %vm1270_vm8 = vweird.f32 %v2750_v24  ;;  %v1274_v3 = vand.u32 2147483647, %v2750_v24  ;;  %v3174_v10 = vor.u32 1.1754944e-38, %v1276_v22  ;;  %v1253_v41 = vmul.f32 %v2997_v30, %v1252_v47 }
 0x2b2   : > { %vm1285_vm10 = vweird.f32 %v2756_v8  ;;  %v1289_v1 = vand.u32 2147483647, %v2756_v8  ;;  %v1291_v29 = vand.u32 2147483648, %v2756_v8  ;;  %v1297_v42 = vsub.f32 1.0, %v1296_v45  ;;  %v3180_v58 = vpop.eup %2012 }
 0x2b3   : > { %v3185_v13 = vsel %vm3075_vm13, %v2839_v11, %v1213_v31  ;;  %v3190_v53 = vsel %vm3081_vm0, %v2857_v27, %v1228_v63  ;;  %v1268_v44 = vmul.f32 %v3017_v61, %v1267_v17  ;;  %2016 = vrcp.f32 %v2781_v2 }
 0x2b4   : > { %v1243_v11 = vsel %vm3196_vm3, %v2908_v33, %v1239_v16  ;;  %vm1256_vm6 = vweird.f32 %v2997_v30  ;;  %v4022_v27 = vand.u32 2147483647, %v2744_v20  ;;  %v1283_v37 = vmul.f32 %v3044_v38, %v1282_v40 }
 0x2b5   : > { %v1311_v50 = vmul.f32 %v3165_v19, %v2765_v43  ;;  %vm1271_vm0 = vweird.f32 %v3017_v61  ;;  %vm3216_vm4 = vcmp.eq.f32.partialorder %v1274_v3, 8.507059e+37  ;;  %v1304_v33 = vand.u32 2147483647, %v2763_v23  ;;  %vm3250_vm2 = vmor %vm1255_vm11, %vm1256_vm6 }
 0x2b6   : > { %vm3208_vm13 = vcmp.eq.f32.partialorder %v4022_v27, 8.507059e+37  ;;  %v1306_v7 = vand.u32 2147483648, %v2763_v23  ;;  %2018 = vrcp.f32 %v2789_v54  ;;  %v3223_v62 = vpop.eup %2014  ;;  %v1254_v21 = vadd.f32 %v2997_v30, %v1253_v41  ;;  %vm3268_vm7 = vmor %vm1270_vm8, %vm1271_vm0  ;;  %v4040_v27 = vld [vmem:[#allocation12_spill] sm:$0xff] }
 0x2b7   : > { %vm3226_vm5 = vcmp.eq.f32.partialorder %v1289_v1, 8.507059e+37  ;;  %v1292_v28 = vor.u32 1.1754944e-38, %v1291_v29  ;;  %v1298_v48 = vmul.f32 %v3088_v26, %v1297_v42  ;;  %v1326_v34 = vmul.f32 %v3180_v58, %v2771_v51 }
 0x2b8   : > { %v3236_v22 = vsel %vm3136_vm15, %v3013_v35, %v1243_v11  ;;  %v1269_v4 = vadd.f32 %v3017_v61, %v1268_v44  ;;  %vm1300_vm14 = vweird.f32 %v2763_v23  ;;  %v1321_v18 = vand.u32 2147483648, %v2765_v43  ;;  %v4037_v44 = vld [vmem:[#allocation11_spill] sm:$0xff] }
 0x2b9   : > { %v1284_v55 = vadd.f32 %v3044_v38, %v1283_v37  ;;  %vm1286_vm1 = vweird.f32 %v3044_v38  ;;  %v1312_v47 = vsub.f32 1.0, %v1311_v50  ;;  %2020 = vrcp.f32 %v2794_v56  ;;  %v3244_v45 = vpop.eup %2016 }
 0x2ba   : > { %vm3254_vm15 = vcmp.eq.f32.partialorder %v1304_v33, 8.507059e+37  ;;  %v1307_v31 = vor.u32 1.1754944e-38, %v1306_v7  ;;  %v1319_v39 = vand.u32 2147483647, %v2765_v43  ;;  %v1341_v17 = vmul.f32 %v3223_v62, %v2779_v52  ;;  %vm3284_vm11 = vmor %vm1285_vm10, %vm1286_vm1 }
 0x2bb   : > { %v1258_v63 = vsel %vm3250_vm2, %v2997_v30, %v1254_v21  ;;  %v1299_v16 = vadd.f32 %v3088_v26, %v1298_v48  ;;  %vm1301_vm9 = vweird.f32 %v3088_v26  ;;  %vm1315_vm12 = vweird.f32 %v2765_v43 }
 0x2bc   : > { %v1327_v40 = vsub.f32 1.0, %v1326_v34  ;;  %v3275_v3 = vpop.eup %2018  ;;  %v1273_v30 = vsel %vm3268_vm7, %v3017_v61, %v1269_v4  ;;  %v1322_v41 = vor.u32 1.1754944e-38, %v1321_v18  ;;  %v1334_v1 = vand.u32 2147483647, %v2771_v51  ;;  %vm3304_vm8 = vmor %vm1300_vm14, %vm1301_vm9 }
 0x2bd   : > { %v1336_v29 = vand.u32 2147483648, %v2771_v51  ;;  %v1288_v42 = vsel %vm3284_vm11, %v3044_v38, %v1284_v55  ;;  %v1313_v59 = vmul.f32 %v3165_v19, %v1312_v47  ;;  %v1356_v61 = vmul.f32 %v3244_v45, %v2781_v2 }
 0x2be   : > { %2022 = vrcp.f32 %v4037_v44  ;;  %v3300_v8 = vsel %vm3208_vm13, %v3015_v15, %v1258_v63  ;;  %vm1330_vm10 = vweird.f32 %v2771_v51  ;;  %v1342_v38 = vsub.f32 1.0, %v1341_v17 }
 0x2bf   : > { %2024 = vrcp.f32 %v4040_v27  ;;  %v3310_v37 = vpop.eup %2020  ;;  %v3315_v50 = vsel %vm3216_vm4, %v3174_v10, %v1273_v30  ;;  %v1303_v23 = vsel %vm3304_vm8, %v3088_v26, %v1299_v16  ;;  %vm3320_vm3 = vcmp.eq.f32.partialorder %v1319_v39, 8.507059e+37  ;;  %v4049_v30 = vld [vmem:[#allocation13_spill] sm:$0xff] }
 0x2c0   : > { %v1328_v46 = vmul.f32 %v3180_v58, %v1327_v40  ;;  %v1371_v33 = vmul.f32 %v3275_v3, %v2789_v54  ;;  %v3329_v7 = vsel %vm3226_vm5, %v1292_v28, %v1288_v42  ;;  %vm1316_vm6 = vweird.f32 %v3165_v19  ;;  %v4052_v42 = vld [vmem:[#allocation14_spill] sm:$0xff] }
 0x2c1   : > { %v1349_v10 = vand.u32 2147483647, %v2779_v52  ;;  %v1351_v57 = vand.u32 2147483648, %v2779_v52  ;;  %v1314_v26 = vadd.f32 %v3165_v19, %v1313_v59  ;;  %vm3335_vm13 = vcmp.eq.f32.partialorder %v1334_v1, 8.507059e+37  ;;  %vm3360_vm14 = vmor %vm1315_vm12, %vm1316_vm6 }
 0x2c2   : > { %v1337_v48 = vor.u32 1.1754944e-38, %v1336_v29  ;;  %vm1345_vm0 = vweird.f32 %v2779_v52  ;;  %v1357_v34 = vsub.f32 1.0, %v1356_v61  ;;  %v3342_v9 = vsel %vm3254_vm15, %v1307_v31, %v1303_v23 }
 0x2c3   : > { %vm1331_vm4 = vweird.f32 %v3180_v58  ;;  %v1343_v28 = vmul.f32 %v3223_v62, %v1342_v38  ;;  %v1386_v4 = vmul.f32 %v3310_v37, %v2794_v56  ;;  %v1329_v55 = vadd.f32 %v3180_v58, %v1328_v46 }
 0x2c4   : > { %v3348_v18 = vpop.eup %2022  ;;  %vm1360_vm5 = vweird.f32 %v2781_v2  ;;  %v1364_v47 = vand.u32 2147483647, %v2781_v2  ;;  %v1366_v35 = vand.u32 2147483648, %v2781_v2  ;;  %v1372_v60 = vsub.f32 1.0, %v1371_v33  ;;  %vm3381_vm7 = vmor %vm1330_vm10, %vm1331_vm4 }
 0x2c5   : > { %v3354_v31 = vpop.eup %2024  ;;  %vm1346_vm1 = vweird.f32 %v3223_v62  ;;  %vm3365_vm2 = vcmp.eq.f32.partialorder %v1349_v10, 8.507059e+37  ;;  %v1352_v63 = vor.u32 1.1754944e-38, %v1351_v57  ;;  %v1379_v20 = vand.u32 2147483647, %v2789_v54 }
 0x2c6   : > { %v1318_v16 = vsel %vm3360_vm14, %v3165_v19, %v1314_v26  ;;  %v1358_v40 = vmul.f32 %v3244_v45, %v1357_v34  ;;  %vm1375_vm15 = vweird.f32 %v2789_v54  ;;  %v1381_v43 = vand.u32 2147483648, %v2789_v54  ;;  %vm3410_vm11 = vmor %vm1345_vm0, %vm1346_vm1 }
 0x2c7   : > { %2026 = vrcp.f32 %v4049_v30  ;;  %v1344_v1 = vadd.f32 %v3223_v62, %v1343_v28  ;;  %v1387_v29 = vsub.f32 1.0, %v1386_v4  ;;  %v1401_v19 = vmul.f32 %v3348_v18, %v4037_v44 }
 0x2c8   : > { %2028 = vrcp.f32 %v4052_v42  ;;  %v1333_v59 = vsel %vm3381_vm7, %v3180_v58, %v1329_v55  ;;  %vm3392_vm9 = vcmp.eq.f32.partialorder %v1364_v47, 8.507059e+37  ;;  %v1367_v51 = vor.u32 1.1754944e-38, %v1366_v35  ;;  %v4059_v47 = vld [vmem:[#allocation15_spill] sm:$0xff] }
 0x2c9   : > { %v1373_v11 = vmul.f32 %v3275_v3, %v1372_v60  ;;  %v1416_v38 = vmul.f32 %v3354_v31, %v4040_v27  ;;  %v3401_v23 = vsel %vm3320_vm3, %v1322_v41, %v1318_v16  ;;  %vm1361_vm12 = vweird.f32 %v3244_v45 }
 0x2ca   : > { %v1394_v46 = vand.u32 2147483647, %v2794_v56  ;;  %v1396_v58 = vand.u32 2147483648, %v2794_v56  ;;  %v1359_v10 = vadd.f32 %v3244_v45, %v1358_v40  ;;  %vm3415_vm8 = vcmp.eq.f32.partialorder %v1379_v20, 8.507059e+37  ;;  %vm3439_vm6 = vmor %vm1360_vm5, %vm1361_vm12 }
 0x2cb   : > { %v1382_v41 = vor.u32 1.1754944e-38, %v1381_v43  ;;  %vm1390_vm10 = vweird.f32 %v2794_v56  ;;  %v3422_v57 = vsel %vm3335_vm13, %v1337_v48, %v1333_v59  ;;  %v1348_v52 = vsel %vm3410_vm11, %v3223_v62, %v1344_v1 }
 0x2cc   : > { %v1388_v26 = vmul.f32 %v3310_v37, %v1387_v29  ;;  %v1402_v34 = vsub.f32 1.0, %v1401_v19  ;;  %v1374_v4 = vadd.f32 %v3275_v3, %v1373_v11  ;;  %vm1376_vm3 = vweird.f32 %v3275_v3  ;;  %v4066_v29 = vld [vmem:[#allocation16_spill] sm:$0xff] }
 0x2cd   : > { %v3428_v28 = vpop.eup %2026  ;;  %v1417_v55 = vsub.f32 1.0, %v1416_v38  ;;  %2030 = vrcp.f32 %v4059_v47  ;;  %vm3443_vm13 = vcmp.eq.f32.partialorder %v1394_v46, 8.507059e+37  ;;  %v1397_v48 = vor.u32 1.1754944e-38, %v1396_v58  ;;  %vm3461_vm4 = vmor %vm1375_vm15, %vm1376_vm3 }
 0x2ce   : > { %v3433_v35 = vpop.eup %2028  ;;  %vm1405_vm0 = vweird.f32 %v4037_v44  ;;  %v1409_v60 = vand.u32 2147483647, %v4037_v44  ;;  %v1411_v39 = vand.u32 2147483648, %v4037_v44  ;;  %v3452_v20 = vsel %vm3365_vm2, %v1352_v63, %v1348_v52  ;;  %v2048_v44 = vld [vmem:[%s2321_s24 + $0x20] sm:$0xff] }
 0x2cf   : > { %v1363_v2 = vsel %vm3439_vm6, %v3244_v45, %v1359_v10  ;;  %v1424_v16 = vand.u32 2147483647, %v4040_v27  ;;  %v1426_v40 = vand.u32 2147483648, %v4040_v27  ;;  %v1389_v24 = vadd.f32 %v3310_v37, %v1388_v26 }
 0x2d0   : > { %vm1391_vm5 = vweird.f32 %v3310_v37  ;;  %v1403_v17 = vmul.f32 %v3348_v18, %v1402_v34  ;;  %v1431_v63 = vmul.f32 %v3428_v28, %v4049_v30  ;;  %v1378_v45 = vsel %vm3461_vm4, %v3275_v3, %v1374_v4 }
 0x2d1   : > { %v1418_v1 = vmul.f32 %v3354_v31, %v1417_v55  ;;  %v1446_v54 = vmul.f32 %v3433_v35, %v4052_v42  ;;  %2032 = vrcp.f32 %v4066_v29  ;;  %v3479_v19 = vsel %vm3392_vm9, %v1367_v51, %v1363_v2  ;;  %vm3490_vm2 = vmor %vm1390_vm10, %vm1391_vm5 }
 0x2d2   : > { %vm3481_vm14 = vcmp.eq.f32.partialorder %v1409_v60, 8.507059e+37  ;;  %v1412_v11 = vor.u32 1.1754944e-38, %v1411_v39  ;;  %vm1420_vm1 = vweird.f32 %v4040_v27  ;;  %vm1406_vm15 = vweird.f32 %v3348_v18  ;;  %v2054_v27 = vld [vmem:[%s2321_s24 + $0x50] sm:$0xff] }
 0x2d3   : > { %v3486_v38 = vpop.eup %2030  ;;  %vm3495_vm7 = vcmp.eq.f32.partialorder %v1424_v16, 8.507059e+37  ;;  %v1427_v51 = vor.u32 1.1754944e-38, %v1426_v40  ;;  %v1441_v46 = vand.u32 2147483648, %v4049_v30  ;;  %v3502_v58 = vsel %vm3415_vm8, %v1382_v41, %v1378_v45  ;;  %vm3527_vm11 = vmor %vm1405_vm0, %vm1406_vm15  ;;  %v4076_v16 = vld [vmem:[#allocation18_spill] sm:$0xff]  ;;  %v4079_v40 = vld [vmem:[#allocation19_spill] sm:$0xff] }
 0x2d4   : > { %v1393_v56 = vsel %vm3490_vm2, %v3310_v37, %v1389_v24  ;;  %v1404_v33 = vadd.f32 %v3348_v18, %v1403_v17  ;;  %v1432_v10 = vsub.f32 1.0, %v1431_v63  ;;  %v1419_v52 = vadd.f32 %v3354_v31, %v1418_v1  ;;  %v4073_v37 = vld [vmem:[#allocation17_spill] sm:$0xff]  ;;  %v4080_v17 = vld [vmem:[#allocation20_spill] sm:$0xff] }
 0x2d5   : > { %vm1421_vm9 = vweird.f32 %v3354_v31  ;;  %v1439_v26 = vand.u32 2147483647, %v4049_v30  ;;  %v1447_v34 = vsub.f32 1.0, %v1446_v54  ;;  %vm1435_vm12 = vweird.f32 %v4049_v30 }
 0x2d6   : > { %v1454_v15 = vand.u32 2147483647, %v4052_v42  ;;  %v1456_v41 = vand.u32 2147483648, %v4052_v42  ;;  %v1461_v4 = vmul.f32 %v3486_v38, %v4059_v47  ;;  %2034 = vrcp.f32 %v4073_v37  ;;  %vm3543_vm10 = vmor %vm1420_vm1, %vm1421_vm9 }
 0x2d7   : > { %v3517_v55 = vpop.eup %2032  ;;  %v3521_v62 = vsel %vm3443_vm13, %v1397_v48, %v1393_v56  ;;  %v3531_v39 = vor.u32 1.1754944e-38, %v1441_v46  ;;  %vm1450_vm8 = vweird.f32 %v4052_v42  ;;  %v1471_v2 = vand.u32 2147483648, %v4059_v47 }
 0x2d8   : > { %2036 = vrcp.f32 %v4076_v16  ;;  %v1408_v21 = vsel %vm3527_vm11, %v3348_v18, %v1404_v33  ;;  %v1433_v48 = vmul.f32 %v3428_v28, %v1432_v10  ;;  %vm1436_vm3 = vweird.f32 %v3428_v28  ;;  %v2044_v10 = vld [vmem:[%s2321_s24] sm:$0xff] }
 0x2d9   : > { %2038 = vrcp.f32 %v4079_v40  ;;  %v1423_v43 = vsel %vm3543_vm10, %v3354_v31, %v1419_v52  ;;  %v1448_v18 = vmul.f32 %v3433_v35, %v1447_v34  ;;  %v1469_v24 = vand.u32 2147483647, %v4059_v47 }
 0x2da   : > { %2040 = vrcp.f32 %v4080_v17  ;;  %vm3556_vm6 = vcmp.eq.f32.partialorder %v1439_v26, 8.507059e+37  ;;  %v3560_v63 = vor.u32 1.1754944e-38, %v1456_v41  ;;  %v1462_v45 = vsub.f32 1.0, %v1461_v4 }
 0x2db   : > { %v1476_v1 = vmul.f32 %v3517_v55, %v4066_v29  ;;  %2042 = vrcp.f32 %v3000_v12  ;;  %v3567_v31 = vsel %vm3481_vm14, %v1412_v11, %v1408_v21  ;;  %vm1451_vm13 = vweird.f32 %v3433_v35  ;;  %v2047_v21 = vld [vmem:[%s2321_s24 + $0x18] sm:$0xff]  ;;  %vm3614_vm14 = vmor %vm1435_vm12, %vm1436_vm3 }
 0x2dc   : > { %v3570_v54 = vor.u32 1.1754944e-38, %v1471_v2  ;;  %v1486_v3 = vand.u32 2147483648, %v4066_v29  ;;  %v3573_v46 = vpop.eup %2034  ;;  %v3577_v56 = vsel %vm3495_vm7, %v1427_v51, %v1423_v43  ;;  %v1434_v33 = vadd.f32 %v3428_v28, %v1433_v48  ;;  %v2045_v51 = vld [vmem:[%s2321_s24 + $0x8] sm:$0xff]  ;;  %vm3635_vm1 = vmor %vm1450_vm8, %vm1451_vm13 }
 0x2dd   : > { %vm3580_vm0 = vcmp.eq.f32.partialorder %v1454_v15, 8.507059e+37  ;;  %vm1465_vm4 = vweird.f32 %v4059_v47  ;;  %v1484_v11 = vand.u32 2147483647, %v4066_v29  ;;  %v1565_v52 = vmul.f32 %v2044_v10, %v3022_v49  ;;  %v2046_v15 = vld [vmem:[%s2321_s24 + $0x10] sm:$0xff]  ;;  %v2059_v10 = vld [vmem:[%s2321_s24 + $0x78] sm:$0xff] }
 0x2de   : > { %v3588_v26 = vpop.eup %2036  ;;  %v1449_v61 = vadd.f32 %v3433_v35, %v1448_v18  ;;  %vm1466_vm5 = vweird.f32 %v3486_v38  ;;  %v1566_v34 = vmul.f32 %v2045_v51, %v3027_v0  ;;  %v1567_v41 = vmul.f32 %v2046_v15, %v3049_v32  ;;  %v2049_v18 = vld [vmem:[%s2321_s24 + $0x28] sm:$0xff]  ;;  %v2051_v51 = vld [vmem:[%s2321_s24 + $0x38] sm:$0xff] }
 0x2df   : > { %v3596_v4 = vpop.eup %2038  ;;  %v1463_v60 = vmul.f32 %v3486_v38, %v1462_v45  ;;  %v1477_v2 = vsub.f32 1.0, %v1476_v1  ;;  %v1568_v49 = vmul.f32 %v2047_v21, %v3103_v14  ;;  %v1569_v48 = vmul.f32 %v2048_v44, %v3108_v5  ;;  %1597 = vst [vmem:[%s3605_s18] sm:$0xff] %v1565_v52  ;;  %vm3695_vm12 = vmor %vm1465_vm4, %vm1466_vm5 }
 0x2e0   : > { %v3608_v0 = vpop.eup %2040  ;;  %v3618_v14 = vor.u32 1.1754944e-38, %v1486_v3  ;;  %v1491_v5 = vmul.f32 %v3573_v46, %v4073_v37  ;;  %v1499_v43 = vand.u32 2147483647, %v4073_v37  ;;  %v1570_v45 = vmul.f32 %v2049_v18, %v3123_v25  ;;  %1598 = vst [vmem:[%s3605_s18 + $0x8] sm:$0xff] %v1566_v34  ;;  %v2055_v18 = vld [vmem:[%s2321_s24 + $0x58] sm:$0xff] }
 0x2e1   : > { %v3626_v1 = vpop.eup %2042  ;;  %v1438_v30 = vsel %vm3614_vm14, %v3428_v28, %v1434_v33  ;;  %vm3639_vm2 = vcmp.eq.f32.partialorder %v1469_v24, 8.507059e+37  ;;  %vm1480_vm15 = vweird.f32 %v4066_v29  ;;  %v1501_v25 = vand.u32 2147483648, %v4073_v37  ;;  %v2050_v33 = vld [vmem:[%s2321_s24 + $0x30] sm:$0xff]  ;;  %1599 = vst [vmem:[%s3605_s18 + $0x10] sm:$0xff] %v1567_v41 }
 0x2e2   : > { %v1506_v28 = vmul.f32 %v3588_v26, %v4076_v16  ;;  %v1571_v42 = vmul.f32 %v2050_v33, %v3145_v6  ;;  %v1453_v24 = vsel %vm3635_vm1, %v3433_v35, %v1449_v61  ;;  %vm1481_vm7 = vweird.f32 %v3517_v55  ;;  %1600 = vst [vmem:[%s3605_s18 + $0x18] sm:$0xff] %v1568_v49  ;;  %v2052_v35 = vld [vmem:[%s2321_s24 + $0x40] sm:$0xff]  ;;  %v2053_v49 = vld [vmem:[%s2321_s24 + $0x48] sm:$0xff] }
 0x2e3   : > { %v1521_v52 = vmul.f32 %v3596_v4, %v4079_v40  ;;  %v1572_v34 = vmul.f32 %v2051_v51, %v3170_v36  ;;  %v1464_v15 = vadd.f32 %v3486_v38, %v1463_v60  ;;  %v1478_v6 = vmul.f32 %v3517_v55, %v1477_v2  ;;  %1601 = vst [vmem:[%s3605_s18 + $0x20] sm:$0xff] %v1569_v48 }
 0x2e4   : > { %v1536_v41 = vmul.f32 %v3608_v0, %v4080_v17  ;;  %v1573_v61 = vmul.f32 %v2052_v35, %v3185_v13  ;;  %v3669_v21 = vsel %vm3556_vm6, %v3531_v39, %v1438_v30  ;;  %v1492_v36 = vsub.f32 1.0, %v1491_v5  ;;  %1602 = vst [vmem:[%s3605_s18 + $0x28] sm:$0xff] %v1570_v45  ;;  %v2056_v30 = vld [vmem:[%s2321_s24 + $0x60] sm:$0xff]  ;;  %vm3733_vm6 = vmor %vm1480_vm15, %vm1481_vm7 }
 0x2e5   : > { %v1551_v60 = vmul.f32 %v3626_v1, %v3000_v12  ;;  %v1574_v2 = vmul.f32 %v2053_v49, %v3190_v53  ;;  %vm3676_vm9 = vcmp.eq.f32.partialorder %v1484_v11, 8.507059e+37  ;;  %v3680_v13 = vor.u32 1.1754944e-38, %v1501_v25  ;;  %1603 = vst [vmem:[%s3605_s18 + $0x30] sm:$0xff] %v1571_v42  ;;  %v2062_v49 = vld [vmem:[%s2321_s24 + $0x90] sm:$0xff] }
 0x2e6   : > { %v1507_v48 = vsub.f32 1.0, %v1506_v28  ;;  %v1516_v39 = vand.u32 2147483648, %v4076_v16  ;;  %v1575_v32 = vmul.f32 %v2054_v27, %v3236_v22  ;;  %v3689_v53 = vsel %vm3580_vm0, %v3560_v63, %v1453_v24  ;;  %1604 = vst [vmem:[%s3605_s18 + $0x38] sm:$0xff] %v1572_v34  ;;  %v2057_v28 = vld [vmem:[%s2321_s24 + $0x68] sm:$0xff] }
 0x2e7   : > { %vm1495_vm11 = vweird.f32 %v4073_v37  ;;  %v1514_v22 = vand.u32 2147483647, %v4076_v16  ;;  %v1522_v5 = vsub.f32 1.0, %v1521_v52  ;;  %v1576_v59 = vmul.f32 %v2055_v18, %v3300_v8  ;;  %1605 = vst [vmem:[%s3605_s18 + $0x40] sm:$0xff] %v1573_v61  ;;  %v2061_v61 = vld [vmem:[%s2321_s24 + $0x88] sm:$0xff] }
 0x2e8   : > { %v1468_v63 = vsel %vm3695_vm12, %v3486_v38, %v1464_v15  ;;  %v1479_v47 = vadd.f32 %v3517_v55, %v1478_v6  ;;  %vm1510_vm8 = vweird.f32 %v4076_v16  ;;  %v1537_v45 = vsub.f32 1.0, %v1536_v41  ;;  %1606 = vst [vmem:[%s3605_s18 + $0x48] sm:$0xff] %v1574_v2  ;;  %v2060_v41 = vld [vmem:[%s2321_s24 + $0x80] sm:$0xff] }
 0x2e9   : > { %v1577_v3 = vmul.f32 %v2056_v30, %v3315_v50  ;;  %v1493_v25 = vmul.f32 %v3573_v46, %v1492_v36  ;;  %vm1496_vm10 = vweird.f32 %v3573_v46  ;;  %v1552_v8 = vsub.f32 1.0, %v1551_v60  ;;  %v2058_v50 = vld [vmem:[%s2321_s24 + $0x70] sm:$0xff]  ;;  %1607 = vst [vmem:[%s3605_s18 + $0x50] sm:$0xff] %v1575_v32  ;;  %v2064_v32 = vld [vmem:[%s2321_s24 + $0xa0] sm:$0xff] }
 0x2ea   : > { %v1578_v38 = vmul.f32 %v2057_v28, %v3329_v7  ;;  %v1508_v33 = vmul.f32 %v3588_v26, %v1507_v48  ;;  %v3718_v42 = vor.u32 1.1754944e-38, %v1516_v39  ;;  %vm1525_vm3 = vweird.f32 %v4079_v40  ;;  %1608 = vst [vmem:[%s3605_s18 + $0x58] sm:$0xff] %v1576_v59  ;;  %vm3784_vm1 = vmor %vm1495_vm11, %vm1496_vm10  ;;  %v2066_v59 = vld [vmem:[%s2321_s24 + $0xb0] sm:$0xff]  ;;  %v2072_v7 = vld [vmem:[%s2321_s24 + $0xe0] sm:$0xff] }
 0x2eb   : > { %v1579_v24 = vmul.f32 %v2058_v50, %v3342_v9  ;;  %v3727_v52 = vsel %vm3639_vm2, %v3570_v54, %v1468_v63  ;;  %vm3739_vm13 = vcmp.eq.f32.partialorder %v1499_v43, 8.507059e+37  ;;  %v1523_v9 = vmul.f32 %v3596_v4, %v1522_v5  ;;  %1609 = vst [vmem:[%s3605_s18 + $0x60] sm:$0xff] %v1577_v3  ;;  %v2065_v5 = vld [vmem:[%s2321_s24 + $0xa8] sm:$0xff]  ;;  %v2071_v50 = vld [vmem:[%s2321_s24 + $0xd8] sm:$0xff] }
 0x2ec   : > { %v1529_v54 = vand.u32 2147483647, %v4079_v40  ;;  %v1580_v34 = vmul.f32 %v2059_v10, %v3401_v23  ;;  %v1483_v29 = vsel %vm3733_vm6, %v3517_v55, %v1479_v47  ;;  %vm3751_vm0 = vcmp.eq.f32.partialorder %v1514_v22, 8.507059e+37  ;;  %1610 = vst [vmem:[%s3605_s18 + $0x68] sm:$0xff] %v1578_v38  ;;  %v2074_v10 = vld [vmem:[%s2321_s24 + $0xf0] sm:$0xff] }
 0x2ed   : > { %v1531_v15 = vand.u32 2147483648, %v4079_v40  ;;  %v1538_v6 = vmul.f32 %v3608_v0, %v1537_v45  ;;  %v1581_v35 = vmul.f32 %v2060_v41, %v3422_v57  ;;  %v1494_v23 = vadd.f32 %v3573_v46, %v1493_v25  ;;  %1611 = vst [vmem:[%s3605_s18 + $0x70] sm:$0xff] %v1579_v24 }
 0x2ee   : > { %vm1540_vm4 = vweird.f32 %v4080_v17  ;;  %v1553_v55 = vmul.f32 %v3626_v1, %v1552_v8  ;;  %v1582_v36 = vmul.f32 %v2061_v61, %v3452_v20  ;;  %v1509_v60 = vadd.f32 %v3588_v26, %v1508_v33  ;;  %v2063_v20 = vld [vmem:[%s2321_s24 + $0x98] sm:$0xff]  ;;  %1612 = vst [vmem:[%s3605_s18 + $0x78] sm:$0xff] %v1580_v34  ;;  %v2069_v8 = vld [vmem:[%s2321_s24 + $0xc8] sm:$0xff]  ;;  %v2070_v33 = vld [vmem:[%s2321_s24 + $0xd0] sm:$0xff] }
 0x2ef   : > { %vm1511_vm5 = vweird.f32 %v3588_v26  ;;  %v1544_v57 = vand.u32 2147483647, %v4080_v17  ;;  %v1583_v2 = vmul.f32 %v2062_v49, %v3479_v19  ;;  %v1488_v48 = vsel %vm3676_vm9, %v3618_v14, %v1483_v29  ;;  %1613 = vst [vmem:[%s3605_s18 + $0x80] sm:$0xff] %v1581_v35  ;;  %v2075_v29 = vld [vmem:[%s2321_s24 + $0xf8] sm:$0xff] }
 0x2f0   : > { %v1524_v39 = vadd.f32 %v3596_v4, %v1523_v9  ;;  %vm1526_vm14 = vweird.f32 %v3596_v4  ;;  %v1584_v27 = vmul.f32 %v2063_v20, %v3502_v58  ;;  %v1539_v14 = vadd.f32 %v3608_v0, %v1538_v6  ;;  %vm3801_vm15 = vmor %vm1510_vm8, %vm1511_vm5  ;;  %1614 = vst [vmem:[%s3605_s18 + $0x88] sm:$0xff] %v1582_v36  ;;  %v2073_v9 = vld [vmem:[%s2321_s24 + $0xe8] sm:$0xff] }
 0x2f1   : > { %vm1541_vm2 = vweird.f32 %v3608_v0  ;;  %v1546_v44 = vand.u32 2147483648, %v4080_v17  ;;  %v1585_v58 = vmul.f32 %v2064_v32, %v3521_v62  ;;  %v1498_v37 = vsel %vm3784_vm1, %v3573_v46, %v1494_v23  ;;  %vm3817_vm9 = vmor %vm1525_vm3, %vm1526_vm14  ;;  %1615 = vst [vmem:[%s3605_s18 + $0x90] sm:$0xff] %v1583_v2 }
 0x2f2   : > { %v1554_v22 = vadd.f32 %v3626_v1, %v1553_v55  ;;  %vm1556_vm7 = vweird.f32 %v3626_v1  ;;  %v1586_v62 = vmul.f32 %v2065_v5, %v3567_v31  ;;  %v1513_v46 = vsel %vm3801_vm15, %v3588_v26, %v1509_v60  ;;  %vm3836_vm11 = vmor %vm1540_vm4, %vm1541_vm2  ;;  %1616 = vst [vmem:[%s3605_s18 + $0x98] sm:$0xff] %v1584_v27 }
 0x2f3   : > { %vm3821_vm12 = vcmp.eq.f32.partialorder %v1529_v54, 8.507059e+37  ;;  %v1561_v31 = vand.u32 2147483648, %v3000_v12  ;;  %v1587_v63 = vmul.f32 %v2066_v59, %v3577_v56  ;;  %v1528_v40 = vsel %vm3817_vm9, %v3596_v4, %v1524_v39  ;;  %v2067_v56 = vld [vmem:[%s2321_s24 + $0xb8] sm:$0xff]  ;;  %1617 = vst [vmem:[%s3605_s18 + $0xa0] sm:$0xff] %v1585_v58 }
 0x2f4   : > { %vm1555_vm8 = vweird.f32 %v3000_v12  ;;  %v1559_v47 = vand.u32 2147483647, %v3000_v12  ;;  %v1588_v45 = vmul.f32 %v2067_v56, %v3669_v21  ;;  %v1503_v4 = vsel %vm3739_vm13, %v3680_v13, %v1498_v37  ;;  %v2068_v21 = vld [vmem:[%s2321_s24 + $0xc0] sm:$0xff]  ;;  %1618 = vst [vmem:[%s3605_s18 + $0xa8] sm:$0xff] %v1586_v62  ;;  %s2126_s24 = scalar_lea.hbm %s3930_s9, 512 }
 0x2f5   : > { %v1532_v17 = vor.u32 1.1754944e-38, %v1531_v15  ;;  %v1543_v30 = vsel %vm3836_vm11, %v3608_v0, %v1539_v14  ;;  %vm3854_vm10 = vmor %vm1555_vm8, %vm1556_vm7  ;;  %v1589_v3 = vmul.f32 %v2068_v21, %v3689_v53  ;;  %v1518_v13 = vsel %vm3751_vm0, %v3718_v42, %v1513_v46  ;;  %1619 = vst [vmem:[%s3605_s18 + $0xb0] sm:$0xff] %v1587_v63  ;;  %p2128_p1 = scmp.lt.s32.totalorder %s2126_s24, %s2122_s26 }
 0x2f6   : > { %v1547_v25 = vor.u32 1.1754944e-38, %v1546_v44  ;;  %v1558_v0 = vsel %vm3854_vm10, %v3626_v1, %v1554_v22  ;;  %v1590_v28 = vmul.f32 %v2069_v8, %v3727_v52  ;;  %vm1545_vm3 = vcmp.eq.f32.partialorder %v1544_v57, 8.507059e+37  ;;  %1620 = vst [vmem:[%s3605_s18 + $0xb8] sm:$0xff] %v1588_v45 }
 0x2f7   : > { %v1533_v53 = vsel %vm3821_vm12, %v1532_v17, %v1528_v40  ;;  %v1562_v38 = vor.u32 1.1754944e-38, %v1561_v31  ;;  %v1591_v42 = vmul.f32 %v2070_v33, %v1488_v48  ;;  %vm1560_vm6 = vcmp.eq.f32.partialorder %v1559_v47, 8.507059e+37  ;;  %1621 = vst [vmem:[%s3605_s18 + $0xc0] sm:$0xff] %v1589_v3  ;;  %p2129_p3 = por %p2128_p1, %p2127_p0 }
 0x2f8   : > { %v1548_v1 = vsel %vm1545_vm3, %v1547_v25, %v1543_v30  ;;  %v1592_v24 = vmul.f32 %v2071_v50, %v1503_v4  ;;  %v1593_v51 = vmul.f32 %v2072_v7, %v1518_v13  ;;  %v1594_v54 = vmul.f32 %v2073_v9, %v1533_v53  ;;  %1622 = vst [vmem:[%s3605_s18 + $0xc8] sm:$0xff] %v1590_v28 }
 0x2f9   : > { %v1563_v52 = vsel %vm1560_vm6, %v1562_v38, %v1558_v0  ;;  %v1595_v34 = vmul.f32 %v2074_v10, %v1548_v1  ;;  %1623 = vst [vmem:[%s3605_s18 + $0xd0] sm:$0xff] %v1591_v42  ;;  %p2130_p4 = pnand %p2129_p3, %p2125_p13 }
 0x2fa   : > { %v1596_v43 = vmul.f32 %v2075_v29, %v1563_v52  ;;  %1624 = vst [vmem:[%s3605_s18 + $0xd8] sm:$0xff] %v1592_v24 }
 0x2fb   : > { %1625 = vst [vmem:[%s3605_s18 + $0xe0] sm:$0xff] %v1593_v51 }
 0x2fc   : > { %1626 = vst [vmem:[%s3605_s18 + $0xe8] sm:$0xff] %v1594_v54 }
 0x2fd   : > { %1627 = vst [vmem:[%s3605_s18 + $0xf0] sm:$0xff] %v1595_v34 }
 0x2fe   : > { %1628 = vst [vmem:[%s3605_s18 + $0xf8] sm:$0xff] %v1596_v43 }
 0x2ff   : > { %2133 = shalt.err (!%p2130_p4)
}
 0x300   : > { %s2177_s14 = smov 128   ;;  %s2178_s18 = smov 8  }
 0x301   : > { %1863 = dma.vmem_to_hbm [thread:$0]  (%p2279_p11), %s1643_s17, 4096, %s1645_s25, %s1630_s19, %s2177_s14, %s2177_s14, %s2178_s18  }
 0x302 PF: > { %s1659_s11 = sand.u32 1, %s2160_s30   ;;  %p4113_p7 = scmp.ge.s32.totalorder %s2172_s12, 2 }
 0x303   : > { %s1660_s13 = scalar_lea.sflag [#allocation4], %s1659_s11 }
 0x304   : > { %p1870_p5 = pnand %p4113_p7, %p2283_p12 }
 0x306   : > { %p1871_p8 = pneg %p1870_p5 }
 0x308   : > { %2155 = dma.done.wait (%p1871_p8), %s1660_s13, 4096  }
 0x309   : > { %2157 = vsyncadd (%p1871_p8), %s1660_s13, 4294963200  ;;  %s4114_s12 = sld [smem:[#allocation9_spill]]  ;;  %s4117_s30 = smov %s2164_s10 }
 0x30a   : > { %s4115_s29 = sld [smem:[#allocation8_spill]] }
 0x30b   : > { %s4116_s11 = sld [smem:[#allocation10_spill]] }
 0x30f   : > { %p22_p10 = scmp.ge.s32.totalorder %s4114_s12, 4  }
 0x310   : > { %s4118_s10 = smov %s4115_s29 }
 0x311   :  { %24 = sbr.rel (!%p22_p10) target bundleno = 5 (0x5), region = 101 }
 0x316   :  { %1666 = vsyncpa [#allocation3], 1 }
 0x317   :  { %1668 = vsyncpa [#allocation3 + $0x1], 1 }
 0x318   :  { %1669 = vsyncpa [#allocation4], 1 }
 0x319   :  { %1671 = vsyncpa [#allocation4 + $0x1], 1 }

</bundles_post_ra>
